<compile_context>
chip_gen: v6e
topology: v6e:2x2x1
jax: 0.10.0
libtpu: 0.0.40
codegen_flags: <defaults>
</compile_context>

<pallas_src>
import functools

import jax
import jax.numpy as jnp
from jax import lax
from jax.experimental import pallas as pl
from jax.experimental.pallas import tpu as pltpu

VMEM = pltpu.MemorySpace.VMEM


def _vspec():
    return pl.BlockSpec(memory_space=VMEM)


def _split_dim(dim, max_tile):
    """Returns (tile, n_tiles, padded_dim): full dim if small, else tiled grid."""
    if dim <= max_tile:
        return dim, 1, dim
    n = -(-dim // max_tile)
    return max_tile, n, n * max_tile


# ----------------------------------------------------------------------------
# Kernel: tiled matmul (bf16 MXU operands, f32 accumulation) with fused ReLU on
# the A operand and fused per-column (sum, sum^2) BatchNorm batch statistics.
# ----------------------------------------------------------------------------
def _mm_kernel(a_ref, b_ref, o_ref, sum_ref, sq_ref, acc_ref, *, apply_relu, n_k):
    i = pl.program_id(1)            # M tile
    k = pl.program_id(2)            # K tile

    @pl.when(k == 0)
    def _():
        acc_ref[...] = jnp.zeros_like(acc_ref)

    a = a_ref[...]
    if apply_relu:
        a = jnp.maximum(a, 0.0)
    acc_ref[...] += jnp.dot(a.astype(jnp.bfloat16), b_ref[...],
                            preferred_element_type=jnp.float32)

    last = k == n_k - 1

    @pl.when(last)
    def _():
        o_ref[...] = acc_ref[...].astype(o_ref.dtype)

    @pl.when(last & (i == 0))
    def _():
        acc = acc_ref[...]
        sum_ref[...] = jnp.sum(acc, axis=0, keepdims=True)
        sq_ref[...] = jnp.sum(acc * acc, axis=0, keepdims=True)

    @pl.when(last & (i > 0))
    def _():
        acc = acc_ref[...]
        sum_ref[...] += jnp.sum(acc, axis=0, keepdims=True)
        sq_ref[...] += jnp.sum(acc * acc, axis=0, keepdims=True)


@functools.partial(jax.jit, static_argnames=('apply_relu',))
def conv_mm(a, b, *, apply_relu=False):
    """out = [relu](a) @ b, plus per-column sum and sum-of-squares of out."""
    M, K = a.shape
    _, N = b.shape
    b = b.astype(jnp.bfloat16)
    tm, nm, Mp = _split_dim(M, 256)
    tk, nk, Kp = _split_dim(K, 512)
    tn, nn_, Np = _split_dim(N, 256)
    if Mp > M:                                   # rare ragged-edge pad (zeros)
        a = jnp.pad(a, ((0, Mp - M), (0, 0)))
    if Kp > K:
        a = jnp.pad(a, ((0, 0), (0, Kp - K)))
        b = jnp.pad(b, ((0, Kp - K), (0, 0)))
    if Np > N:
        b = jnp.pad(b, ((0, 0), (0, Np - N)))
    out, s, q = pl.pallas_call(
        functools.partial(_mm_kernel, apply_relu=apply_relu, n_k=nk),
        grid=(nn_, nm, nk),
        in_specs=[pl.BlockSpec((tm, tk), lambda j, i, k: (i, k)),
                  pl.BlockSpec((tk, tn), lambda j, i, k: (k, j))],
        out_specs=[pl.BlockSpec((tm, tn), lambda j, i, k: (i, j)),
                   pl.BlockSpec((1, tn), lambda j, i, k: (0, j)),
                   pl.BlockSpec((1, tn), lambda j, i, k: (0, j))],
        out_shape=[jax.ShapeDtypeStruct((Mp, Np), jnp.float32),
                   jax.ShapeDtypeStruct((1, Np), jnp.float32),
                   jax.ShapeDtypeStruct((1, Np), jnp.float32)],
        scratch_shapes=[pltpu.VMEM((tm, tn), jnp.float32)],
        compiler_params=pltpu.CompilerParams(
            dimension_semantics=("parallel", "arbitrary", "arbitrary"),
            vmem_limit_bytes=32 * 1024 * 1024),
    )(a, b)
    return out[:M, :N], s[0, :N], q[0, :N]


# ----------------------------------------------------------------------------
# Kernel: depthwise conv, stride 1 (VPU). Shifted windows are read in-kernel
# from the padded input (lane-dense (Hp, Wp*C) layout); ReLU fused.
# ----------------------------------------------------------------------------
def _dw_s1_kernel(x_ref, w_ref, o_ref, *, k, dil, Ho, Wo, C):
    x = jnp.maximum(x_ref[0], 0.0)                       # (Hp, Wp*C)
    acc = jnp.zeros((Ho, Wo * C), jnp.float32)
    for kh in range(k):
        for kw in range(k):
            sl = lax.slice(x, (kh * dil, kw * dil * C),
                           (kh * dil + Ho, (kw * dil + Wo) * C))
            acc = acc + sl * w_ref[kh * k + kw, :][None, :]
    o_ref[0] = acc.astype(o_ref.dtype)


@functools.partial(jax.jit, static_argnames=('k', 'pad', 'dil'))
def depthwise_s1(x, dw, *, k, pad, dil):
    B, H, W, C = x.shape
    xp = jnp.pad(x, ((0, 0), (pad, pad), (pad, pad), (0, 0)))
    Hp, Wp = H + 2 * pad, W + 2 * pad
    Ho, Wo = H, W
    x2 = xp.reshape(B, Hp, Wp * C)
    w_tiled = jnp.tile(dw, (1, Wo))                      # (k*k, Wo*C)
    out = pl.pallas_call(
        functools.partial(_dw_s1_kernel, k=k, dil=dil, Ho=Ho, Wo=Wo, C=C),
        grid=(B,),
        in_specs=[pl.BlockSpec((1, Hp, Wp * C), lambda b: (b, 0, 0)),
                  pl.BlockSpec((k * k, Wo * C), lambda b: (0, 0))],
        out_specs=pl.BlockSpec((1, Ho, Wo * C), lambda b: (b, 0, 0)),
        out_shape=jax.ShapeDtypeStruct((B, Ho, Wo * C), jnp.bfloat16),
        compiler_params=pltpu.CompilerParams(dimension_semantics=("parallel",)),
    )(x2, w_tiled)
    return out.reshape(B, Ho, Wo, C)


# ----------------------------------------------------------------------------
# Kernel: depthwise conv, strided (reduction-cell) path via a per-tap stack.
# ----------------------------------------------------------------------------
def _dw_taps_kernel(p_ref, w_ref, o_ref, *, kk):
    acc = jnp.maximum(p_ref[0], 0.0) * w_ref[0, :][None, :]
    for t in range(1, kk):
        acc = acc + jnp.maximum(p_ref[t], 0.0) * w_ref[t, :][None, :]
    o_ref[...] = acc.astype(o_ref.dtype)


@functools.partial(jax.jit, static_argnames=('k', 'stride', 'pad', 'dil'))
def depthwise_strided(x, dw, *, k, stride, pad, dil):
    # TODO(synk): stride-2 windows still come from JAX tap extraction; tile the
    # row dimension for very large inputs.
    B, H, W, C = x.shape
    pats, Ho, Wo = extract_patches(x, k, stride, pad, dil, 0.0)
    p2 = pats.reshape(k * k, B * Ho, Wo * C)
    w_tiled = jnp.tile(dw, (1, Wo))
    out = pl.pallas_call(
        functools.partial(_dw_taps_kernel, kk=k * k),
        in_specs=[_vspec(), _vspec()],
        out_specs=_vspec(),
        out_shape=jax.ShapeDtypeStruct((B * Ho, Wo * C), jnp.bfloat16),
    )(p2, w_tiled)
    return out.reshape(B, Ho, Wo, C)


# ----------------------------------------------------------------------------
# Kernel: 3x3 pool reductions over a (9, L) lane-dense tap stack, 1-D grid.
# ----------------------------------------------------------------------------
def _maxpool_kernel(p_ref, o_ref):
    o_ref[...] = jnp.max(p_ref[...], axis=0, keepdims=True)


def _avgpool_kernel(p_ref, c_ref, o_ref):
    o_ref[...] = jnp.sum(p_ref[...], axis=0, keepdims=True) * c_ref[...]


# ----------------------------------------------------------------------------
# Kernel: per-channel (column) sum / sum-of-squares, grid-resident outputs.
# ----------------------------------------------------------------------------
def _colstats_kernel(x_ref, sum_ref, sq_ref):
    i = pl.program_id(0)
    x = x_ref[...]
    cs = jnp.sum(x, axis=0, keepdims=True)
    cq = jnp.sum(x * x, axis=0, keepdims=True)

    @pl.when(i == 0)
    def _():
        sum_ref[...] = cs
        sq_ref[...] = cq

    @pl.when(i > 0)
    def _():
        sum_ref[...] += cs
        sq_ref[...] += cq


@jax.jit
def col_stats(y2d):
    M, C = y2d.shape
    tm, nm, Mp = _split_dim(M, 1024)
    if Mp > M:
        y2d = jnp.pad(y2d, ((0, Mp - M), (0, 0)))
    s, q = pl.pallas_call(
        _colstats_kernel,
        grid=(nm,),
        in_specs=[pl.BlockSpec((tm, C), lambda i: (i, 0))],
        out_specs=[pl.BlockSpec((1, C), lambda i: (0, 0)),
                   pl.BlockSpec((1, C), lambda i: (0, 0))],
        out_shape=[jax.ShapeDtypeStruct((1, C), jnp.float32),
                   jax.ShapeDtypeStruct((1, C), jnp.float32)],
        compiler_params=pltpu.CompilerParams(dimension_semantics=("arbitrary",)),
    )(y2d)
    return s[0], q[0]


# ----------------------------------------------------------------------------
# Kernels: lane-dense (rows, W*C) affine (BN apply) and weighted-accumulate
# (BN apply * per-sample mixed-op weight, added in place into the accumulator).
# ----------------------------------------------------------------------------
def _affine_kernel(x_ref, s_ref, t_ref, o_ref):
    o_ref[...] = x_ref[...] * s_ref[...] + t_ref[...]


def _wacc_kernel(x_ref, s_ref, t_ref, w_ref, a_ref, o_ref):
    o_ref[...] = a_ref[...] + w_ref[...] * (x_ref[...] * s_ref[...] + t_ref[...])


@jax.jit
def bn_apply(y, scale_c, shift_c):
    B, H, W, C = y.shape
    R, L = B * H, W * C
    y2 = y.reshape(R, L)
    srow = jnp.tile(scale_c, W).reshape(1, L)
    trow = jnp.tile(shift_c, W).reshape(1, L)
    tr, nr, Rp = _split_dim(R, 256)
    if Rp > R:
        y2 = jnp.pad(y2, ((0, Rp - R), (0, 0)))
    out = pl.pallas_call(
        _affine_kernel,
        grid=(nr,),
        in_specs=[pl.BlockSpec((tr, L), lambda i: (i, 0)),
                  pl.BlockSpec((1, L), lambda i: (0, 0)),
                  pl.BlockSpec((1, L), lambda i: (0, 0))],
        out_specs=pl.BlockSpec((tr, L), lambda i: (i, 0)),
        out_shape=jax.ShapeDtypeStruct((Rp, L), jnp.float32),
        compiler_params=pltpu.CompilerParams(dimension_semantics=("parallel",)),
    )(y2, srow, trow)
    return out[:R].reshape(B, H, W, C)


@functools.partial(jax.jit, donate_argnums=(0,))
def wacc(acc, y, scale_c, shift_c, w_b):
    """acc += w_b[b] * (y * scale + shift), lane-dense (B*H, W*C) layout."""
    B, Ho, Wo, C = y.shape
    R, L = B * Ho, Wo * C
    y2 = y.reshape(R, L).astype(jnp.float32)
    srow = jnp.tile(scale_c, Wo).reshape(1, L)
    trow = jnp.tile(shift_c, Wo).reshape(1, L)
    wrow = jnp.repeat(w_b, Ho).reshape(R, 1)
    tr, nr, Rp = _split_dim(R, 256)
    if Rp > R:
        y2 = jnp.pad(y2, ((0, Rp - R), (0, 0)))
        wrow = jnp.pad(wrow, ((0, Rp - R), (0, 0)))
        acc = jnp.pad(acc, ((0, Rp - R), (0, 0)))
    out = pl.pallas_call(
        _wacc_kernel,
        grid=(nr,),
        in_specs=[pl.BlockSpec((tr, L), lambda i: (i, 0)),
                  pl.BlockSpec((1, L), lambda i: (0, 0)),
                  pl.BlockSpec((1, L), lambda i: (0, 0)),
                  pl.BlockSpec((tr, 1), lambda i: (i, 0)),
                  pl.BlockSpec((tr, L), lambda i: (i, 0))],
        out_specs=pl.BlockSpec((tr, L), lambda i: (i, 0)),
        out_shape=jax.ShapeDtypeStruct((Rp, L), jnp.float32),
        input_output_aliases={4: 0},
        compiler_params=pltpu.CompilerParams(dimension_semantics=("parallel",)),
    )(y2, srow, trow, wrow, acc)
    return out[:R]


# ----------------------------------------------------------------------------
# Kernel: global average pool (AdaptiveAvgPool2d(1) + flatten).
# ----------------------------------------------------------------------------
def _gap_kernel(x_ref, o_ref):
    o_ref[...] = jnp.mean(x_ref[...], axis=1)


@jax.jit
def global_avg_pool(x):
    B, H, W, C = x.shape
    x3 = x.reshape(B, H * W, C)
    return pl.pallas_call(
        _gap_kernel,
        out_shape=jax.ShapeDtypeStruct((B, C), x.dtype),
        in_specs=[_vspec()],
        out_specs=_vspec(),
    )(x3)


# ------------------------------ JAX glue ------------------------------------

def extract_patches(x, k, stride, pad, dilation, pad_value=0.0):
    """x: (B,H,W,C) -> (k*k, B, Ho, Wo, C) shifted windows (glue)."""
    B, H, W, C = x.shape
    xp = jnp.pad(x, ((0, 0), (pad, pad), (pad, pad), (0, 0)),
                 constant_values=pad_value)
    Hp, Wp = H + 2 * pad, W + 2 * pad
    Ho = (Hp - dilation * (k - 1) - 1) // stride + 1
    Wo = (Wp - dilation * (k - 1) - 1) // stride + 1
    pats = []
    for kh in range(k):
        for kw in range(k):
            sl = xp[:,
                    kh * dilation: kh * dilation + (Ho - 1) * stride + 1: stride,
                    kw * dilation: kw * dilation + (Wo - 1) * stride + 1: stride,
                    :]
            pats.append(sl)
    return jnp.stack(pats, axis=0), Ho, Wo


def bn_scale_shift(s, q, count, gamma, beta, eps=1e-5):
    """Training-mode BatchNorm2d: batch stats, biased variance (clamped >= 0)."""
    mean = s / count
    var = jnp.maximum(q / count - mean * mean, 0.0)
    inv = lax.rsqrt(var + eps)
    scale = gamma * inv
    shift = beta - mean * scale
    return scale, shift


@functools.partial(jax.jit, static_argnames=('pool_type', 'stride'))
def pool_prebn(x, *, pool_type, stride):
    """3x3 pool (max / avg with count_include_pad=False); returns pooled NHWC
    plus per-channel (sum, sum^2) for the following BatchNorm."""
    B, H, W, C = x.shape
    padval = float('-inf') if pool_type == 'max' else 0.0
    pats, Ho, Wo = extract_patches(x, 3, stride, 1, 1, pad_value=padval)
    Ltot = B * Ho * Wo * C
    p2 = pats.reshape(9, Ltot)
    tl, nl, Lp = _split_dim(Ltot, 2048)
    if Lp > Ltot:
        p2 = jnp.pad(p2, ((0, 0), (0, Lp - Ltot)))
    cparams = pltpu.CompilerParams(dimension_semantics=("parallel",))
    if pool_type == 'max':
        pooled = pl.pallas_call(
            _maxpool_kernel,
            grid=(nl,),
            in_specs=[pl.BlockSpec((9, tl), lambda l: (0, l))],
            out_specs=pl.BlockSpec((1, tl), lambda l: (0, l)),
            out_shape=jax.ShapeDtypeStruct((1, Lp), jnp.float32),
            compiler_params=cparams,
        )(p2)
    else:
        # Analytic valid-tap counts (no per-channel mask patches).
        sh = jnp.arange(Ho) * stride - 1
        sw = jnp.arange(Wo) * stride - 1
        ch = jnp.minimum(sh + 3, H) - jnp.maximum(sh, 0)
        cw = jnp.minimum(sw + 3, W) - jnp.maximum(sw, 0)
        inv = (1.0 / (ch[:, None] * cw[None, :])).astype(jnp.float32)
        invl = jnp.broadcast_to(inv[None, :, :, None],
                                (B, Ho, Wo, C)).reshape(1, Ltot)
        if Lp > Ltot:
            invl = jnp.pad(invl, ((0, 0), (0, Lp - Ltot)))
        pooled = pl.pallas_call(
            _avgpool_kernel,
            grid=(nl,),
            in_specs=[pl.BlockSpec((9, tl), lambda l: (0, l)),
                      pl.BlockSpec((1, tl), lambda l: (0, l))],
            out_specs=pl.BlockSpec((1, tl), lambda l: (0, l)),
            out_shape=jax.ShapeDtypeStruct((1, Lp), jnp.float32),
            compiler_params=cparams,
        )(p2, invl)
    pooled = pooled[:, :Ltot]
    s, q = col_stats(pooled.reshape(B * Ho * Wo, C))
    return pooled.reshape(B, Ho, Wo, C), s, q


# ------------------------------ DARTS ops ------------------------------------

def std_conv_forward(x, p):
    """ReLU -> 1x1 conv -> BN (ReLU fused into matmul, BN stats fused)."""
    B, H, W, C = x.shape
    y, s, q = conv_mm(x.reshape(B * H * W, C), p['w'], apply_relu=True)
    cout = p['w'].shape[1]
    scale, shift = bn_scale_shift(s, q, B * H * W, p['bn_g'], p['bn_b'])
    return bn_apply(y.reshape(B, H, W, cout), scale, shift)


def fact_reduce_prebn(x, p):
    """FactorizedReduce up to (but excluding) its BN; returns BN scale/shift."""
    # TODO(synk): assumes even H/W (true for this architecture's inputs).
    B, H, W, C = x.shape
    x1 = x[:, ::2, ::2, :]
    x2 = x[:, 1::2, 1::2, :]
    Ho, Wo = x1.shape[1], x1.shape[2]
    y1, s1, q1 = conv_mm(x1.reshape(B * Ho * Wo, C), p['w1'], apply_relu=True)
    y2, s2, q2 = conv_mm(x2.reshape(B * Ho * Wo, C), p['w2'], apply_relu=True)
    ch = p['w1'].shape[1]
    y = jnp.concatenate([y1.reshape(B, Ho, Wo, ch),
                         y2.reshape(B, Ho, Wo, ch)], axis=-1)
    s = jnp.concatenate([s1, s2])
    q = jnp.concatenate([q1, q2])
    scale, shift = bn_scale_shift(s, q, B * Ho * Wo, p['bn_g'], p['bn_b'])
    return y, scale, shift


def dil_conv_prebn(x, p, k, stride, pad, dil):
    """ReLU -> depthwise kxk -> pointwise 1x1 (pre-BN); returns BN scale/shift."""
    B, H, W, C = x.shape
    if stride == 1:
        dwo = depthwise_s1(x, p['dw'], k=k, pad=pad, dil=dil)
    else:
        dwo = depthwise_strided(x, p['dw'], k=k, stride=stride, pad=pad, dil=dil)
    Bo, Ho, Wo, _ = dwo.shape
    y, s, q = conv_mm(dwo.reshape(Bo * Ho * Wo, C), p['pw'], apply_relu=False)
    cout = p['pw'].shape[1]
    scale, shift = bn_scale_shift(s, q, Bo * Ho * Wo, p['bn_g'], p['bn_b'])
    return y.reshape(Bo, Ho, Wo, cout), scale, shift


def stem_forward(x, p):
    # TODO(synk): the stem's 3x3 im2col is still materialized in JAX glue
    # (runs once per forward on a tiny tensor).
    B, H, W, Cin = x.shape
    pats, Ho, Wo = extract_patches(x, 3, 1, 1, 1, 0.0)
    a = pats.transpose(1, 2, 3, 0, 4).reshape(B * Ho * Wo, 9 * Cin)
    y, s, q = conv_mm(a, p['w'], apply_relu=False)
    cout = p['w'].shape[1]
    scale, shift = bn_scale_shift(s, q, B * Ho * Wo, p['bn_g'], p['bn_b'])
    return bn_apply(y.reshape(B, Ho, Wo, cout), scale, shift)


def mixed_edge_accum(acc, x, edge_params, w_edge, primitives, stride):
    """Accumulate sum_o w_edge[:,o] * op_o(x) into acc ((B*Ho, Wo*C), in place)."""
    B, H, W, C = x.shape
    for o, prim in enumerate(primitives):
        if prim == 'none':            # Zero op: contributes w * 0, skip.
            continue
        wcol = w_edge[:, o]
        p = edge_params[prim]
        if prim == 'skip_connect':
            if stride == 1:           # identity: scaled add
                y = x
                scale = jnp.ones((C,), jnp.float32)
                shift = jnp.zeros((C,), jnp.float32)
            else:
                y, scale, shift = fact_reduce_prebn(x, p)
        elif prim in ('max_pool_3x3', 'avg_pool_3x3'):
            ptype = 'max' if prim == 'max_pool_3x3' else 'avg'
            y, s, q = pool_prebn(x, pool_type=ptype, stride=stride)
            m = y.shape[0] * y.shape[1] * y.shape[2]
            scale, shift = bn_scale_shift(s, q, m, p['bn_g'], p['bn_b'])
        elif prim in ('sep_conv_3x3', 'sep_conv_5x5'):
            k = 3 if prim == 'sep_conv_3x3' else 5
            pad = 1 if k == 3 else 2
            y1, sc1, sh1 = dil_conv_prebn(x, p['dc1'], k, stride, pad, 1)
            y1 = bn_apply(y1, sc1, sh1)
            y, scale, shift = dil_conv_prebn(y1, p['dc2'], k, 1, pad, 1)
        elif prim in ('dil_conv_3x3', 'dil_conv_5x5'):
            k = 3 if prim == 'dil_conv_3x3' else 5
            pad = 2 if k == 3 else 4
            y, scale, shift = dil_conv_prebn(x, p, k, stride, pad, 2)
        else:
            raise ValueError(prim)
        acc = wacc(acc, y, scale, shift, wcol)
    return acc


def cell_forward(s0, s1, cell, weights, primitives):
    if cell['reduction_p']:
        y0, sc, sh = fact_reduce_prebn(s0, cell['preproc0'])
        s0 = bn_apply(y0, sc, sh)
    else:
        s0 = std_conv_forward(s0, cell['preproc0'])
    s1 = std_conv_forward(s1, cell['preproc1'])
    states = [s0, s1]
    B, H, W, C = s1.shape
    red = cell['reduction']
    Ho, Wo = (H // 2, W // 2) if red else (H, W)
    for node_params, w_node in zip(cell['dag'], weights):
        acc = jnp.zeros((B * Ho, Wo * C), jnp.float32)
        for j, (edge_params, s) in enumerate(zip(node_params, states)):
            stride = 2 if (red and j < 2) else 1
            acc = mixed_edge_accum(acc, s, edge_params, w_node[:, j, :],
                                   primitives, stride)
        states.append(acc.reshape(B, Ho, Wo, C))
    return jnp.concatenate(states[2:], axis=-1)


# --------------------------- parameter construction ---------------------------

def _init_dense(key, k, cin, cout):
    fan_in = float(k * k * cin)
    w = jax.random.normal(key, (k * k * cin, cout), jnp.float32) / (fan_in ** 0.5)
    return w.astype(jnp.bfloat16)          # MXU operands stored bf16


def _init_std_conv(key, cin, cout):
    return {'w': _init_dense(key, 1, cin, cout),
            'bn_g': jnp.ones((cout,), jnp.float32),
            'bn_b': jnp.zeros((cout,), jnp.float32)}


def _init_fact_reduce(key, cin, cout):
    k1, k2 = jax.random.split(key)
    return {'w1': _init_dense(k1, 1, cin, cout // 2),
            'w2': _init_dense(k2, 1, cin, cout // 2),
            'bn_g': jnp.ones((cout,), jnp.float32),
            'bn_b': jnp.zeros((cout,), jnp.float32)}


def _init_dil_conv(key, k, cin, cout):
    kd, kp = jax.random.split(key)
    dw = jax.random.normal(kd, (k * k, cin), jnp.float32) / (float(k * k) ** 0.5)
    return {'dw': dw,                       # per-tap, per-channel (VPU, f32)
            'pw': _init_dense(kp, 1, cin, cout),
            'bn_g': jnp.ones((cout,), jnp.float32),
            'bn_b': jnp.zeros((cout,), jnp.float32)}


def _init_mixed_op(key, C, stride, primitives):
    keys = jax.random.split(key, len(primitives))
    params = {}
    for prim, kk in zip(primitives, keys):
        if prim in ('max_pool_3x3', 'avg_pool_3x3'):
            params[prim] = {'bn_g': jnp.ones((C,), jnp.float32),
                            'bn_b': jnp.zeros((C,), jnp.float32)}
        elif prim == 'skip_connect':
            params[prim] = {} if stride == 1 else _init_fact_reduce(kk, C, C)
        elif prim in ('sep_conv_3x3', 'sep_conv_5x5'):
            ks = 3 if prim == 'sep_conv_3x3' else 5
            k1, k2 = jax.random.split(kk)
            params[prim] = {'dc1': _init_dil_conv(k1, ks, C, C),
                            'dc2': _init_dil_conv(k2, ks, C, C)}
        elif prim in ('dil_conv_3x3', 'dil_conv_5x5'):
            ks = 3 if prim == 'dil_conv_3x3' else 5
            params[prim] = _init_dil_conv(kk, ks, C, C)
        elif prim == 'none':
            params[prim] = {}
        else:
            raise ValueError(prim)
    return params


def build_params(key, primitives, C_in, C, n_classes, n_layers, n_nodes,
                 stem_multiplier):
    keys = iter(jax.random.split(key, 4096))
    nk = lambda: next(keys)
    n_ops = len(primitives)

    params = {}
    C_cur = stem_multiplier * C
    params['stem'] = {'w': _init_dense(nk(), 3, C_in, C_cur),
                      'bn_g': jnp.ones((C_cur,), jnp.float32),
                      'bn_b': jnp.zeros((C_cur,), jnp.float32)}

    C_pp, C_p, C_cur = C_cur, C_cur, C
    cells = []
    reduction_p = False
    for i in range(n_layers):
        reduction = i in (n_layers // 3, 2 * n_layers // 3)
        if reduction:
            C_cur *= 2
        cell = {'reduction': reduction, 'reduction_p': reduction_p}
        if reduction_p:
            cell['preproc0'] = _init_fact_reduce(nk(), C_pp, C_cur)
        else:
            cell['preproc0'] = _init_std_conv(nk(), C_pp, C_cur)
        cell['preproc1'] = _init_std_conv(nk(), C_p, C_cur)
        dag = []
        for node in range(n_nodes):
            edges = []
            for j in range(2 + node):
                stride = 2 if (reduction and j < 2) else 1
                edges.append(_init_mixed_op(nk(), C_cur, stride, primitives))
            dag.append(edges)
        cell['dag'] = dag
        cells.append(cell)
        reduction_p = reduction
        C_cur_out = C_cur * n_nodes
        C_pp, C_p = C_p, C_cur_out
    params['cells'] = cells

    params['linear'] = {
        'w': (jax.random.normal(nk(), (C_p, n_classes), jnp.float32)
              / (float(C_p) ** 0.5)).astype(jnp.bfloat16),
        'b': jnp.zeros((n_classes,), jnp.float32),
    }
    params['q_gamma_normal'] = [0.001 * jax.random.normal(nk(), (i + 2, n_ops),
                                                          jnp.float32)
                                for i in range(n_nodes)]
    params['q_gamma_reduce'] = [0.001 * jax.random.normal(nk(), (i + 2, n_ops),
                                                          jnp.float32)
                                for i in range(n_nodes)]
    return params, C_p


# ------------------------------- controller forward -------------------------------

def controller_forward(params, x_nchw, key, *, primitives, t,
                       stochastic_gamma=True):
    x = jnp.transpose(x_nchw, (0, 2, 3, 1)).astype(jnp.float32)  # NCHW -> NHWC
    B = x.shape[0]

    s = stem_forward(x, params['stem'])
    s0 = s1 = s

    for cell in params['cells']:
        gammas = (params['q_gamma_reduce'] if cell['reduction']
                  else params['q_gamma_normal'])
        weights = []
        for g in gammas:
            if stochastic_gamma:
                key, sub = jax.random.split(key)
                u = jax.random.uniform(sub, (B,) + g.shape, jnp.float32,
                                       minval=1e-10, maxval=1.0)
                gumbel = -jnp.log(-jnp.log(u))
                # RelaxedOneHotCategorical(temperature=t, logits=g).rsample([B])
                weights.append(jax.nn.softmax((g[None] + gumbel) / t, axis=-1))
            else:
                weights.append(jnp.broadcast_to(g[None], (B,) + g.shape))
        s0, s1 = s1, cell_forward(s0, s1, cell, weights, primitives)

    pooled = global_avg_pool(s1)              # AdaptiveAvgPool2d(1) + flatten
    logits, _, _ = conv_mm(pooled, params['linear']['w'], apply_relu=False)
    return logits + params['linear']['b'][None, :]


# ------------------------------------ main ------------------------------------

if __name__ == "__main__":
    cfg = {
        'input_channels': 4, 'init_channels': 8, 'n_classes': 10,
        'layers': 3, 'n_nodes': 2, 'stem_multiplier': 3,
        'initial temp': 1.0, 'stochastic gamma': 1, 'stochastic w': 1,
        'primitives': 'DARTS',
    }
    primitives = ['max_pool_3x3', 'avg_pool_3x3', 'skip_connect', 'sep_conv_3x3',
                  'sep_conv_5x5', 'dil_conv_3x3', 'dil_conv_5x5', 'none']

    key = jax.random.PRNGKey(0)
    k_param, k_x, k_gumbel = jax.random.split(key, 3)

    params, _ = build_params(
        k_param, primitives,
        C_in=cfg['input_channels'], C=cfg['init_channels'],
        n_classes=cfg['n_classes'], n_layers=cfg['layers'],
        n_nodes=cfg['n_nodes'], stem_multiplier=cfg['stem_multiplier'])

    # PyTorch-convention NCHW input.
    x = jax.random.normal(k_x, (2, cfg['input_channels'], 16, 16), jnp.float32)

    logits = controller_forward(
        params, x, k_gumbel,
        primitives=primitives, t=float(cfg['initial temp']),
        stochastic_gamma=bool(cfg['stochastic gamma']))
    logits = jax.block_until_ready(logits)

    assert logits.shape == (2, cfg['n_classes'])
    assert bool(jnp.all(jnp.isfinite(logits)))
    print("KERNEL_OK")
</pallas_src>

<mosaic_0001>
module attributes {stable_mosaic.version = 11 : i64} {
  func.func @_mm_kernel(%arg0: i32, %arg1: i32, %arg2: i32, %arg3: memref<256x36xf32, #tpu.memory_space<vmem>>, %arg4: memref<36x24xbf16, #tpu.memory_space<vmem>>, %arg5: memref<256x24xf32, #tpu.memory_space<vmem>>, %arg6: memref<1x24xf32, #tpu.memory_space<vmem>>, %arg7: memref<1x24xf32, #tpu.memory_space<vmem>>, %arg8: memref<256x24xf32, #tpu.memory_space<vmem>>) attributes {dimension_semantics = [#tpu.dimension_semantics<parallel>, #tpu.dimension_semantics<arbitrary>, #tpu.dimension_semantics<arbitrary>], iteration_bounds = array<i64: 1, 2, 1>, scalar_prefetch = 0 : i64, scratch_operands = 1 : i64, tpu.core_type = #tpu.core_type<tc>, window_params = [{transform_indices = @transform_0, window_bounds = array<i64: 256, 36>}, {transform_indices = @transform_1, window_bounds = array<i64: 36, 24>}, {transform_indices = @transform_2, window_bounds = array<i64: 256, 24>}, {transform_indices = @transform_3, window_bounds = array<i64: 1, 24>}, {transform_indices = @transform_4, window_bounds = array<i64: 1, 24>}]} {
    %c0_i32 = arith.constant 0 : i32
    %0 = arith.cmpi eq, %arg2, %c0_i32 : i32
    %1 = arith.extui %0 : i1 to i32
    %c0_i32_0 = arith.constant 0 : i32
    %2 = arith.cmpi ne, %1, %c0_i32_0 : i32
    scf.if %2 {
      %cst_14 = arith.constant 0.000000e+00 : f32
      %21 = vector.broadcast %cst_14 : f32 to vector<256x24xf32>
      %c0_15 = arith.constant 0 : index
      %c0_16 = arith.constant 0 : index
      %22 = vector.load %arg8[%c0_15, %c0_16] : memref<256x24xf32, #tpu.memory_space<vmem>>, vector<256x24xf32>
      tpu.vector_store %arg8[%c0_15, %c0_16], %21 {strides = array<i32>} : memref<256x24xf32, #tpu.memory_space<vmem>>, vector<256x24xf32>,
    } else {
    }
    %c0 = arith.constant 0 : index
    %c0_1 = arith.constant 0 : index
    %3 = vector.load %arg3[%c0, %c0_1] : memref<256x36xf32, #tpu.memory_space<vmem>>, vector<256x36xf32>
    %c0_2 = arith.constant 0 : index
    %c0_3 = arith.constant 0 : index
    %4 = vector.load %arg8[%c0_2, %c0_3] : memref<256x24xf32, #tpu.memory_space<vmem>>, vector<256x24xf32>
    %5 = arith.truncf %3 : vector<256x36xf32> to vector<256x36xbf16>
    %c0_4 = arith.constant 0 : index
    %c0_5 = arith.constant 0 : index
    %6 = vector.load %arg4[%c0_4, %c0_5] : memref<36x24xbf16, #tpu.memory_space<vmem>>, vector<36x24xbf16>
    %cst = arith.constant dense<0.000000e+00> : vector<256x24xf32>
    %7 = tpu.matmul %5, %6, %cst {dimension_numbers = #tpu.dot_dimension_numbers<[1], [0], [0], [1], [0, 0, 1, 1], [], []>} : vector<256x36xbf16>, vector<36x24xbf16>, vector<256x24xf32> -> vector<256x24xf32>
    %8 = arith.addf %4, %7 : vector<256x24xf32>
    %c0_6 = arith.constant 0 : index
    %c0_7 = arith.constant 0 : index
    %9 = vector.load %arg8[%c0_6, %c0_7] : memref<256x24xf32, #tpu.memory_space<vmem>>, vector<256x24xf32>
    tpu.vector_store %arg8[%c0_6, %c0_7], %8 {strides = array<i32>} : memref<256x24xf32, #tpu.memory_space<vmem>>, vector<256x24xf32>,
    %c0_i32_8 = arith.constant 0 : i32
    %10 = arith.cmpi eq, %arg2, %c0_i32_8 : i32
    %11 = arith.extui %10 : i1 to i32
    %c0_i32_9 = arith.constant 0 : i32
    %12 = arith.cmpi ne, %11, %c0_i32_9 : i32
    scf.if %12 {
      %c0_14 = arith.constant 0 : index
      %c0_15 = arith.constant 0 : index
      %21 = vector.load %arg8[%c0_14, %c0_15] : memref<256x24xf32, #tpu.memory_space<vmem>>, vector<256x24xf32>
      %c0_16 = arith.constant 0 : index
      %c0_17 = arith.constant 0 : index
      %22 = vector.load %arg5[%c0_16, %c0_17] : memref<256x24xf32, #tpu.memory_space<vmem>>, vector<256x24xf32>
      tpu.vector_store %arg5[%c0_16, %c0_17], %21 {strides = array<i32>} : memref<256x24xf32, #tpu.memory_space<vmem>>, vector<256x24xf32>,
    } else {
    }
    %c0_i32_10 = arith.constant 0 : i32
    %13 = arith.cmpi eq, %arg1, %c0_i32_10 : i32
    %14 = arith.andi %10, %13 : i1
    %15 = arith.extui %14 : i1 to i32
    %c0_i32_11 = arith.constant 0 : i32
    %16 = arith.cmpi ne, %15, %c0_i32_11 : i32
    scf.if %16 {
      %c0_14 = arith.constant 0 : index
      %c0_15 = arith.constant 0 : index
      %21 = vector.load %arg8[%c0_14, %c0_15] : memref<256x24xf32, #tpu.memory_space<vmem>>, vector<256x24xf32>
      %cst_16 = arith.constant dense<0.000000e+00> : vector<24xf32>
      %22 = vector.multi_reduction <add>, %21, %cst_16 [0] : vector<256x24xf32> to vector<24xf32>
      %23 = vector.shape_cast %22 : vector<24xf32> to vector<1x24xf32>
      %c0_17 = arith.constant 0 : index
      %c0_18 = arith.constant 0 : index
      %24 = vector.load %arg6[%c0_17, %c0_18] : memref<1x24xf32, #tpu.memory_space<vmem>>, vector<1x24xf32>
      tpu.vector_store %arg6[%c0_17, %c0_18], %23 {strides = array<i32>} : memref<1x24xf32, #tpu.memory_space<vmem>>, vector<1x24xf32>,
      %25 = arith.mulf %21, %21 : vector<256x24xf32>
      %cst_19 = arith.constant dense<0.000000e+00> : vector<24xf32>
      %26 = vector.multi_reduction <add>, %25, %cst_19 [0] : vector<256x24xf32> to vector<24xf32>
      %27 = vector.shape_cast %26 : vector<24xf32> to vector<1x24xf32>
      %c0_20 = arith.constant 0 : index
      %c0_21 = arith.constant 0 : index
      %28 = vector.load %arg7[%c0_20, %c0_21] : memref<1x24xf32, #tpu.memory_space<vmem>>, vector<1x24xf32>
      tpu.vector_store %arg7[%c0_20, %c0_21], %27 {strides = array<i32>} : memref<1x24xf32, #tpu.memory_space<vmem>>, vector<1x24xf32>,
    } else {
    }
    %c0_i32_12 = arith.constant 0 : i32
    %17 = arith.cmpi sgt, %arg1, %c0_i32_12 : i32
    %18 = arith.andi %10, %17 : i1
    %19 = arith.extui %18 : i1 to i32
    %c0_i32_13 = arith.constant 0 : i32
    %20 = arith.cmpi ne, %19, %c0_i32_13 : i32
    scf.if %20 {
      %c0_14 = arith.constant 0 : index
      %c0_15 = arith.constant 0 : index
      %21 = vector.load %arg8[%c0_14, %c0_15] : memref<256x24xf32, #tpu.memory_space<vmem>>, vector<256x24xf32>
      %c0_16 = arith.constant 0 : index
      %c0_17 = arith.constant 0 : index
      %22 = vector.load %arg6[%c0_16, %c0_17] : memref<1x24xf32, #tpu.memory_space<vmem>>, vector<1x24xf32>
      %cst_18 = arith.constant dense<0.000000e+00> : vector<24xf32>
      %23 = vector.multi_reduction <add>, %21, %cst_18 [0] : vector<256x24xf32> to vector<24xf32>
      %24 = vector.shape_cast %23 : vector<24xf32> to vector<1x24xf32>
      %25 = arith.addf %22, %24 : vector<1x24xf32>
      %c0_19 = arith.constant 0 : index
      %c0_20 = arith.constant 0 : index
      %26 = vector.load %arg6[%c0_19, %c0_20] : memref<1x24xf32, #tpu.memory_space<vmem>>, vector<1x24xf32>
      tpu.vector_store %arg6[%c0_19, %c0_20], %25 {strides = array<i32>} : memref<1x24xf32, #tpu.memory_space<vmem>>, vector<1x24xf32>,
      %c0_21 = arith.constant 0 : index
      %c0_22 = arith.constant 0 : index
      %27 = vector.load %arg7[%c0_21, %c0_22] : memref<1x24xf32, #tpu.memory_space<vmem>>, vector<1x24xf32>
      %28 = arith.mulf %21, %21 : vector<256x24xf32>
      %cst_23 = arith.constant dense<0.000000e+00> : vector<24xf32>
      %29 = vector.multi_reduction <add>, %28, %cst_23 [0] : vector<256x24xf32> to vector<24xf32>
      %30 = vector.shape_cast %29 : vector<24xf32> to vector<1x24xf32>
      %31 = arith.addf %27, %30 : vector<1x24xf32>
      %c0_24 = arith.constant 0 : index
      %c0_25 = arith.constant 0 : index
      %32 = vector.load %arg7[%c0_24, %c0_25] : memref<1x24xf32, #tpu.memory_space<vmem>>, vector<1x24xf32>
      tpu.vector_store %arg7[%c0_24, %c0_25], %31 {strides = array<i32>} : memref<1x24xf32, #tpu.memory_space<vmem>>, vector<1x24xf32>,
    } else {
    }
    return
  }
  func.func @transform_0(%arg0: i32, %arg1: i32, %arg2: i32) -> (i32, i32) {
    %c0_i32 = arith.constant 0 : i32
    return %arg1, %arg2 : i32, i32
  }
  func.func @transform_1(%arg0: i32, %arg1: i32, %arg2: i32) -> (i32, i32) {
    %c0_i32 = arith.constant 0 : i32
    return %arg2, %arg0 : i32, i32
  }
  func.func @transform_2(%arg0: i32, %arg1: i32, %arg2: i32) -> (i32, i32) {
    %c0_i32 = arith.constant 0 : i32
    return %arg1, %arg0 : i32, i32
  }
  func.func @transform_3(%arg0: i32, %arg1: i32, %arg2: i32) -> (i32, i32) {
    %c0_i32 = arith.constant 0 : i32
    %c0_i32_0 = arith.constant 0 : i32
    return %c0_i32, %arg0 : i32, i32
  }
  func.func @transform_4(%arg0: i32, %arg1: i32, %arg2: i32) -> (i32, i32) {
    %c0_i32 = arith.constant 0 : i32
    %c0_i32_0 = arith.constant 0 : i32
    return %c0_i32, %arg0 : i32, i32
  }
}

</mosaic_0001>

<bundles_post_ra>
// kernel: conv_mm.1
= control target key start
LH: loop header
LB: loop body
LE: loop exit
PB: predicated region body
PF: predicated region fallthrough
CT: control target
= control target key end

     0   :  { %10 = vsyncpa [#allocation4], 0  ;;  %s2001_s0 = inlined_call_operand.vmem [shape: f32[512,36], index: 0, kind: input, shape index: {}]   ;;  %s2002_s1 = inlined_call_operand.vmem [shape: bf16[36,24], index: 1, kind: input, shape index: {}]   ;;  %s2003_s2 = inlined_call_operand.vmem [shape: f32[512,24], index: 2, kind: output, shape index: {0}]   ;;  %s2004_s3 = inlined_call_operand.hbm [shape: f32[1,24], index: 3, kind: output, shape index: {1}]   ;;  %s2005_s4 = inlined_call_operand.hbm [shape: f32[1,24], index: 4, kind: output, shape index: {2}]  }
   0x1   :  { %11 = vsyncpa [#allocation6], 0  ;;  %s1594_s15 = smov 0   ;;  %s1596_s16 = smov 0  }
   0x2   :  { %s1598_s17 = smov 0  }
   0x3 LB: > { %s1340_s18 = sadd.s32 4294967295, %s1564_s17   ;;  %s32_s19 = sadd.s32 1, %s1560_s16  ;;  %s1564_s17 = sphi %s1598_s17, %s17_s17   ;;  %s1560_s16 = sphi %s1596_s16, %s2009_s16   ;;  %s1556_s15 = sphi %s1594_s15, %s2008_s15  }
   0x4   : > { %p34_p0 = scmp.ge.s32.totalorder %s32_s19, 2  ;;  %p1345_p1 = scmp.ge.s32.totalorder %s1564_s17, 1 }
   0x5   : > { %p212_p2 = scmp.lt.s32.totalorder %s1564_s17, 3 }
   0x6   : > { %s2011_s19 = smov (%p34_p0, %s32_s19), 0 }
   0x7   : > { %p213_p3 = pnand %p1345_p1, %p212_p2 }
   0x8   : > { %s1346_s24 = sshll.u32 (!%p213_p3), %s1556_s15, 5  ;;  %p763_p5 = scmp.eq.s32.totalorder (!%p213_p3), %s1556_s15, 0 }
   0x9   : > { %216 = sbr.rel (%p213_p3) target bundleno = 441 (0x1b9), region = 28  ;;  %p1624_p4 = scmp.lt.s32.totalorder (!%p213_p3), %s1346_s24, 63 }
   0xe   : > { %v1483_v0 = vld [vmem:[%s2002_s1 + $0x10] ss:$0 sps:$4 sm:$0x33]   ;;  %vm466_vm0 = vcmask 1041408   ;;  %v1484_v1 = vld [vmem:[%s2002_s1 + $0x8] sm:$0xff]   ;;  %vm284_vm1 = vcmask 195584  }
   0xf   : > { %1442 = vmatprep.subr.msk.bf16.mxu0 %vm466_vm0, %v1483_v0  ;;  %1443 = vmatprep.subr.msk.bf16.mxu1 %vm466_vm0, %v1483_v0  ;;  %v468_v2 = vsel %vm466_vm0, %v1483_v0, 0  ;;  %v1485_v3 = vld [vmem:[%s2002_s1] sm:$0xff]   ;;  %v1566_v4 = vmov 0.0   ;;  %s2013_s24 = smov (!%p1624_p4, %s1346_s24), 63  ;;  %vm417_vm2 = vcmask 293888   ;;  %vm869_vm3 = vcmask (%p763_p5), 188416  }
  0x10   : > { %1399 = vmatpush3.bf16.msra.mxu0 %v468_v2  ;;  %1439 = vmatpush3.bf16.msra.mxu1 %v468_v2  ;;  %287 = vst.msk [vmem:[#allocation2 + $0x10] sm:$0xff] %vm284_vm1, %v1566_v4  ;;  %285 = vst.msk [vmem:[#allocation2] sm:$0xff] %vm284_vm1, %v1566_v4  ;;  %s1347_s28 = sshll.u32 %s2013_s24, 3 }
  0x11   : > { %1400 = vmatprep.subr.bf16.mxu0 %v1484_v1  ;;  %1437 = vmatprep.subr.bf16.mxu1 %v1484_v1  ;;  %286 = vst.msk [vmem:[#allocation2 + $0x8] sm:$0xff] %vm284_vm1, %v1566_v4  ;;  %288 = vst.msk [vmem:[#allocation2 + $0x18] sm:$0xff] %vm284_vm1, %v1566_v4  ;;  %s1675_s5 = scalar_lea.vmem %s2001_s0, %s1347_s28  ;;  %s1737_s8 = scalar_lea.vmem %s2003_s2, %s1347_s28 }
  0x12   : > { %289 = vst.msk [vmem:[#allocation2 + $0x20] sm:$0xff] %vm284_vm1, %v1566_v4  ;;  %290 = vst.msk [vmem:[#allocation2 + $0x28] sm:$0xff] %vm284_vm1, %v1566_v4  ;;  %v317_v5 = vld [vmem:[%s1675_s5] sm:$0xff]  ;;  %v318_v6 = vld [vmem:[%s1675_s5 + $0x8] sm:$0xff] }
  0x13   : > { %291 = vst.msk [vmem:[#allocation2 + $0x30] sm:$0xff] %vm284_vm1, %v1566_v4  ;;  %292 = vst.msk [vmem:[#allocation2 + $0x38] sm:$0xff] %vm284_vm1, %v1566_v4  ;;  %v333_v7 = vld [vmem:[%s1675_s5 + $0x80] sm:$0xff]  ;;  %v381_v8 = vpack.c.bf16 %v318_v6, %v317_v5  ;;  %v334_v9 = vld [vmem:[%s1675_s5 + $0x88] sm:$0xff] }
  0x14   : > { %293 = vst.msk [vmem:[#allocation2 + $0x40] sm:$0xff] %vm284_vm1, %v1566_v4  ;;  %294 = vst.msk [vmem:[#allocation2 + $0x48] sm:$0xff] %vm284_vm1, %v1566_v4  ;;  %1401 = vmatpush3.bf16.msra.mxu0 %v1484_v1  ;;  %1440 = vmatpush3.bf16.msra.mxu1 %v1484_v1  ;;  %v319_v10 = vld [vmem:[%s1675_s5 + $0x10] sm:$0xff]  ;;  %v320_v11 = vld [vmem:[%s1675_s5 + $0x18] sm:$0xff]  ;;  %v389_v12 = vpack.c.bf16 %v334_v9, %v333_v7 }
  0x15   : > { %295 = vst.msk [vmem:[#allocation2 + $0x50] sm:$0xff] %vm284_vm1, %v1566_v4  ;;  %296 = vst.msk [vmem:[#allocation2 + $0x58] sm:$0xff] %vm284_vm1, %v1566_v4  ;;  %1402 = vmatprep.subr.bf16.mxu0 %v1485_v3  ;;  %1438 = vmatprep.subr.bf16.mxu1 %v1485_v3  ;;  %v382_v13 = vpack.c.bf16 %v320_v11, %v319_v10  ;;  %v335_v14 = vld [vmem:[%s1675_s5 + $0x90] sm:$0xff]  ;;  %v336_v15 = vld [vmem:[%s1675_s5 + $0x98] sm:$0xff] }
  0x16   : > { %297 = vst.msk [vmem:[#allocation2 + $0x60] sm:$0xff] %vm284_vm1, %v1566_v4  ;;  %298 = vst.msk [vmem:[#allocation2 + $0x68] sm:$0xff] %vm284_vm1, %v1566_v4  ;;  %v321_v16 = vld [vmem:[%s1675_s5 + $0x20] sm:$0xff]  ;;  %1404 = vmatprep.mubr.msk.bf16.mxu0 %vm417_vm2, %v381_v8  ;;  %v390_v17 = vpack.c.bf16 %v336_v15, %v335_v14  ;;  %v322_v18 = vld [vmem:[%s1675_s5 + $0x28] sm:$0xff]  ;;  %1420 = vmatprep.mubr.msk.bf16.mxu1 %vm417_vm2, %v389_v12 }
  0x17   : > { %299 = vst.msk [vmem:[#allocation2 + $0x70] sm:$0xff] %vm284_vm1, %v1566_v4  ;;  %300 = vst.msk [vmem:[#allocation2 + $0x78] sm:$0xff] %vm284_vm1, %v1566_v4  ;;  %v337_v19 = vld [vmem:[%s1675_s5 + $0xa0] sm:$0xff]  ;;  %v338_v20 = vld [vmem:[%s1675_s5 + $0xa8] sm:$0xff]  ;;  %v383_v21 = vpack.c.bf16 %v322_v18, %v321_v16 }
  0x18   : > { %301 = vst.msk [vmem:[#allocation2 + $0x80] sm:$0xff] %vm284_vm1, %v1566_v4  ;;  %302 = vst.msk [vmem:[#allocation2 + $0x88] sm:$0xff] %vm284_vm1, %v1566_v4  ;;  %1403 = vmatpush3.bf16.msra.mxu0 %v1485_v3  ;;  %1441 = vmatpush3.bf16.msra.mxu1 %v1485_v3  ;;  %v391_v22 = vpack.c.bf16 %v338_v20, %v337_v19  ;;  %v323_v23 = vld [vmem:[%s1675_s5 + $0x30] sm:$0xff]  ;;  %v324_v24 = vld [vmem:[%s1675_s5 + $0x38] sm:$0xff] }
  0x19   : > { %303 = vst.msk [vmem:[#allocation2 + $0x90] sm:$0xff] %vm284_vm1, %v1566_v4  ;;  %304 = vst.msk [vmem:[#allocation2 + $0x98] sm:$0xff] %vm284_vm1, %v1566_v4  ;;  %v339_v25 = vld [vmem:[%s1675_s5 + $0xb0] sm:$0xff]  ;;  %v340_v26 = vld [vmem:[%s1675_s5 + $0xb8] sm:$0xff]  ;;  %v384_v31 = vpack.c.bf16 %v324_v24, %v323_v23 }
  0x1a   : > { %305 = vst.msk [vmem:[#allocation2 + $0xa0] sm:$0xff] %vm284_vm1, %v1566_v4  ;;  %306 = vst.msk [vmem:[#allocation2 + $0xa8] sm:$0xff] %vm284_vm1, %v1566_v4  ;;  %v325_v27 = vld [vmem:[%s1675_s5 + $0x40] sm:$0xff]  ;;  %v326_v28 = vld [vmem:[%s1675_s5 + $0x48] sm:$0xff]  ;;  %v392_v32 = vpack.c.bf16 %v340_v26, %v339_v25 }
  0x1b   : > { %307 = vst.msk [vmem:[#allocation2 + $0xb0] sm:$0xff] %vm284_vm1, %v1566_v4  ;;  %308 = vst.msk [vmem:[#allocation2 + $0xb8] sm:$0xff] %vm284_vm1, %v1566_v4  ;;  %1405 = vmatmul.mubr.msk.bf16.vlgmr.msra.gmra.mxu0 %vm417_vm2, %v382_v13  ;;  %1421 = vmatmul.mubr.msk.bf16.vlgmr.msra.gmra.mxu1 %vm417_vm2, %v390_v17  ;;  %v341_v29 = vld [vmem:[%s1675_s5 + $0xc0] sm:$0xff]  ;;  %v342_v30 = vld [vmem:[%s1675_s5 + $0xc8] sm:$0xff]  ;;  %v385_v33 = vpack.c.bf16 %v326_v28, %v325_v27 }
  0x1c   : > { %309 = vst.msk [vmem:[#allocation2 + $0xc0] sm:$0xff] %vm284_vm1, %v1566_v4  ;;  %310 = vst.msk [vmem:[#allocation2 + $0xc8] sm:$0xff] %vm284_vm1, %v1566_v4  ;;  %1408 = vmatprep.mubr.msk.bf16.mxu0 %vm417_vm2, %v383_v21  ;;  %1424 = vmatprep.mubr.msk.bf16.mxu1 %vm417_vm2, %v391_v22  ;;  %v393_v34 = vpack.c.bf16 %v342_v30, %v341_v29  ;;  %v327_v35 = vld [vmem:[%s1675_s5 + $0x50] sm:$0xff]  ;;  %v328_v36 = vld [vmem:[%s1675_s5 + $0x58] sm:$0xff] }
  0x1d   : > { %311 = vst.msk [vmem:[#allocation2 + $0xd0] sm:$0xff] %vm284_vm1, %v1566_v4  ;;  %312 = vst.msk [vmem:[#allocation2 + $0xd8] sm:$0xff] %vm284_vm1, %v1566_v4  ;;  %v343_v37 = vld [vmem:[%s1675_s5 + $0xd0] sm:$0xff]  ;;  %v344_v38 = vld [vmem:[%s1675_s5 + $0xd8] sm:$0xff]  ;;  %v386_v43 = vpack.c.bf16 %v328_v36, %v327_v35 }
  0x1e   : > { %313 = vst.msk [vmem:[#allocation2 + $0xe0] sm:$0xff] %vm284_vm1, %v1566_v4  ;;  %314 = vst.msk [vmem:[#allocation2 + $0xe8] sm:$0xff] %vm284_vm1, %v1566_v4  ;;  %v329_v39 = vld [vmem:[%s1675_s5 + $0x60] sm:$0xff]  ;;  %v330_v40 = vld [vmem:[%s1675_s5 + $0x68] sm:$0xff]  ;;  %v394_v44 = vpack.c.bf16 %v344_v38, %v343_v37 }
  0x1f   : > { %315 = vst.msk [vmem:[#allocation2 + $0xf0] sm:$0xff] %vm284_vm1, %v1566_v4  ;;  %316 = vst.msk [vmem:[#allocation2 + $0xf8] sm:$0xff] %vm284_vm1, %v1566_v4  ;;  %v345_v41 = vld [vmem:[%s1675_s5 + $0xe0] sm:$0xff]  ;;  %v346_v42 = vld [vmem:[%s1675_s5 + $0xe8] sm:$0xff]  ;;  %v387_v45 = vpack.c.bf16 %v330_v40, %v329_v39 }
  0x20   : > { %v395_v46 = vpack.c.bf16 %v346_v42, %v345_v41  ;;  %v331_v47 = vld [vmem:[%s1675_s5 + $0x70] sm:$0xff]  ;;  %v332_v48 = vld [vmem:[%s1675_s5 + $0x78] sm:$0xff]  ;;  %v349_v57 = vld [vmem:[#allocation2] sm:$0xff] }
  0x21   : > { %v347_v49 = vld [vmem:[%s1675_s5 + $0xf0] sm:$0xff]  ;;  %v348_v50 = vld [vmem:[%s1675_s5 + $0xf8] sm:$0xff]  ;;  %v388_v51 = vpack.c.bf16 %v332_v48, %v331_v47  ;;  %v365_v58 = vld [vmem:[#allocation2 + $0x80] sm:$0xff] }
  0x22   : > { %v396_v52 = vpack.c.bf16 %v348_v50, %v347_v49  ;;  %v351_v53 = vld [vmem:[#allocation2 + $0x10] sm:$0xff]  ;;  %v352_v63 = vld [vmem:[#allocation2 + $0x18] sm:$0xff]  ;;  %v350_v5 = vld [vmem:[#allocation2 + $0x8] sm:$0xff] }
  0x23   : > { %1409 = vmatmul.mubr.msk.bf16.gmra.mxu0 %vm417_vm2, %v384_v31  ;;  %1425 = vmatmul.mubr.msk.bf16.gmra.mxu1 %vm417_vm2, %v392_v32  ;;  %v367_v54 = vld [vmem:[#allocation2 + $0x90] sm:$0xff]  ;;  %v368_v0 = vld [vmem:[#allocation2 + $0x98] sm:$0xff]  ;;  %v366_v6 = vld [vmem:[#allocation2 + $0x88] sm:$0xff] }
  0x24   : > { %1412 = vmatprep.mubr.msk.bf16.mxu0 %vm417_vm2, %v385_v33  ;;  %1428 = vmatprep.mubr.msk.bf16.mxu1 %vm417_vm2, %v393_v34  ;;  %v355_v11 = vld [vmem:[#allocation2 + $0x30] sm:$0xff]  ;;  %v353_v17 = vld [vmem:[#allocation2 + $0x20] sm:$0xff]  ;;  %v356_v21 = vld [vmem:[#allocation2 + $0x38] sm:$0xff] }
  0x25   : > { %v371_v12 = vld [vmem:[#allocation2 + $0xb0] sm:$0xff]  ;;  %v369_v18 = vld [vmem:[#allocation2 + $0xa0] sm:$0xff]  ;;  %v372_v26 = vld [vmem:[#allocation2 + $0xb8] sm:$0xff] }
  0x26   : > { %v354_v29 = vld [vmem:[#allocation2 + $0x28] sm:$0xff]  ;;  %v359_v37 = vld [vmem:[#allocation2 + $0x50] sm:$0xff]  ;;  %v373_v50 = vld [vmem:[#allocation2 + $0xc0] sm:$0xff] }
  0x27   : > { %v370_v34 = vld [vmem:[#allocation2 + $0xa8] sm:$0xff]  ;;  %v375_v42 = vld [vmem:[#allocation2 + $0xd0] sm:$0xff] }
  0x2b   : > { %1413 = vmatmul.mubr.msk.bf16.gmra.mxu0 %vm417_vm2, %v386_v43  ;;  %1429 = vmatmul.mubr.msk.bf16.gmra.mxu1 %vm417_vm2, %v394_v44 }
  0x2c   : > { %1416 = vmatprep.mubr.msk.bf16.mxu0 %vm417_vm2, %v387_v45  ;;  %1432 = vmatprep.mubr.msk.bf16.mxu1 %vm417_vm2, %v395_v46  ;;  %v357_v45 = vld [vmem:[#allocation2 + $0x40] sm:$0xff] }
  0x33   : > { %1417 = vmatmul.mubr.msk.bf16.gmra.mxu0 %vm417_vm2, %v388_v51  ;;  %1433 = vmatmul.mubr.msk.bf16.gmra.mxu1 %vm417_vm2, %v396_v52 }
  0xdb   : > { %v1406_v55 = vpop.f32.mrf.mxu0  ;;  %v1422_v56 = vpop.f32.mrf.mxu1 }
  0xdc   : > { %v633_v59 = vadd.f32 %v1406_v55, %v351_v53  ;;  %v649_v60 = vadd.f32 %v1422_v56, %v367_v54  ;;  %v360_v53 = vld [vmem:[#allocation2 + $0x58] sm:$0xff] }
  0xdd   : > { %v504_v61 = vpop.f32.mrf.mxu0  ;;  %v568_v62 = vpop.f32.mrf.mxu1 }
  0xde   : > { %666 = vst.msk [vmem:[#allocation2 + $0x10] sm:$0xff] %vm284_vm1, %v633_v59  ;;  %682 = vst.msk [vmem:[#allocation2 + $0x90] sm:$0xff] %vm284_vm1, %v649_v60  ;;  %v631_v1 = vadd.f32 %v504_v61, %v349_v57  ;;  %v647_v2 = vadd.f32 %v568_v62, %v365_v58  ;;  %v376_v58 = vld [vmem:[#allocation2 + $0xd8] sm:$0xff]  ;;  %v358_v61 = vld [vmem:[#allocation2 + $0x48] sm:$0xff] }
  0xdf   : > { %v1407_v3 = vpop.f32.mrf.mxu0  ;;  %v1423_v4 = vpop.f32.mrf.mxu1 }
  0xe0   : > { %664 = vst.msk [vmem:[#allocation2] sm:$0xff] %vm284_vm1, %v631_v1  ;;  %680 = vst.msk [vmem:[#allocation2 + $0x80] sm:$0xff] %vm284_vm1, %v647_v2  ;;  %v634_v7 = vadd.f32 %v1407_v3, %v352_v63  ;;  %v650_v8 = vadd.f32 %v1423_v4, %v368_v0  ;;  %v374_v2 = vld [vmem:[#allocation2 + $0xc8] sm:$0xff] }
  0xe1   : > { %v507_v9 = vpop.f32.mrf.mxu0  ;;  %v571_v10 = vpop.f32.mrf.mxu1 }
  0xe2   : > { %667 = vst.msk [vmem:[#allocation2 + $0x18] sm:$0xff] %vm284_vm1, %v634_v7  ;;  %683 = vst.msk [vmem:[#allocation2 + $0x98] sm:$0xff] %vm284_vm1, %v650_v8  ;;  %v632_v13 = vadd.f32 %v507_v9, %v350_v5  ;;  %v648_v14 = vadd.f32 %v571_v10, %v366_v6  ;;  %v363_v5 = vld [vmem:[#allocation2 + $0x70] sm:$0xff] }
  0xe3   : > { %v1410_v15 = vpop.f32.mrf.mxu0  ;;  %v1426_v16 = vpop.f32.mrf.mxu1  ;;  %v379_v10 = vld [vmem:[#allocation2 + $0xf0] sm:$0xff] }
  0xe4   : > { %665 = vst.msk [vmem:[#allocation2 + $0x8] sm:$0xff] %vm284_vm1, %v632_v13  ;;  %681 = vst.msk [vmem:[#allocation2 + $0x88] sm:$0xff] %vm284_vm1, %v648_v14  ;;  %v637_v19 = vadd.f32 %v1410_v15, %v355_v11  ;;  %v653_v20 = vadd.f32 %v1426_v16, %v371_v12  ;;  %v361_v13 = vld [vmem:[#allocation2 + $0x60] sm:$0xff] }
  0xe5   : > { %v701_v22 = vld [vmem:[#allocation2 + $0x10] sm:$0xff]  ;;  %v520_v24 = vpop.f32.mrf.mxu0  ;;  %v584_v25 = vpop.f32.mrf.mxu1 }
  0xe6   : > { %v717_v23 = vld [vmem:[#allocation2 + $0x90] sm:$0xff]  ;;  %733 = vst.msk [vmem:[%s1737_s8 + $0x10] sm:$0xff] %vm284_vm1, %v701_v22  ;;  %670 = vst.msk [vmem:[#allocation2 + $0x30] sm:$0xff] %vm284_vm1, %v637_v19  ;;  %v635_v27 = vadd.f32 %v520_v24, %v353_v17  ;;  %v651_v28 = vadd.f32 %v584_v25, %v369_v18  ;;  %v377_v18 = vld [vmem:[#allocation2 + $0xe0] sm:$0xff] }
  0xe7   : > { %749 = vst.msk [vmem:[%s1737_s8 + $0x90] sm:$0xff] %vm284_vm1, %v717_v23  ;;  %686 = vst.msk [vmem:[#allocation2 + $0xb0] sm:$0xff] %vm284_vm1, %v653_v20  ;;  %v699_v30 = vld [vmem:[#allocation2] sm:$0xff]  ;;  %v1411_v32 = vpop.f32.mrf.mxu0  ;;  %v1427_v33 = vpop.f32.mrf.mxu1 }
  0xe8   : > { %v715_v31 = vld [vmem:[#allocation2 + $0x80] sm:$0xff]  ;;  %731 = vst.msk [vmem:[%s1737_s8] sm:$0xff] %vm284_vm1, %v699_v30  ;;  %668 = vst.msk [vmem:[#allocation2 + $0x20] sm:$0xff] %vm284_vm1, %v635_v27  ;;  %v638_v35 = vadd.f32 %v1411_v32, %v356_v21  ;;  %v654_v36 = vadd.f32 %v1427_v33, %v372_v26  ;;  %v364_v21 = vld [vmem:[#allocation2 + $0x78] sm:$0xff] }
  0xe9   : > { %747 = vst.msk [vmem:[%s1737_s8 + $0x80] sm:$0xff] %vm284_vm1, %v715_v31  ;;  %684 = vst.msk [vmem:[#allocation2 + $0xa0] sm:$0xff] %vm284_vm1, %v651_v28  ;;  %v702_v38 = vld [vmem:[#allocation2 + $0x18] sm:$0xff]  ;;  %v523_v40 = vpop.f32.mrf.mxu0  ;;  %v587_v41 = vpop.f32.mrf.mxu1 }
  0xea   : > { %v718_v39 = vld [vmem:[#allocation2 + $0x98] sm:$0xff]  ;;  %734 = vst.msk [vmem:[%s1737_s8 + $0x18] sm:$0xff] %vm284_vm1, %v702_v38  ;;  %671 = vst.msk [vmem:[#allocation2 + $0x38] sm:$0xff] %vm284_vm1, %v638_v35  ;;  %v636_v43 = vadd.f32 %v523_v40, %v354_v29  ;;  %v652_v44 = vadd.f32 %v587_v41, %v370_v34  ;;  %v362_v29 = vld [vmem:[#allocation2 + $0x68] sm:$0xff] }
  0xeb   : > { %750 = vst.msk [vmem:[%s1737_s8 + $0x98] sm:$0xff] %vm284_vm1, %v718_v39  ;;  %687 = vst.msk [vmem:[#allocation2 + $0xb8] sm:$0xff] %vm284_vm1, %v654_v36  ;;  %v700_v46 = vld [vmem:[#allocation2 + $0x8] sm:$0xff]  ;;  %v1414_v48 = vpop.f32.mrf.mxu0  ;;  %v1430_v49 = vpop.f32.mrf.mxu1  ;;  %v380_v26 = vld [vmem:[#allocation2 + $0xf8] sm:$0xff] }
  0xec   : > { %v716_v47 = vld [vmem:[#allocation2 + $0x88] sm:$0xff]  ;;  %732 = vst.msk [vmem:[%s1737_s8 + $0x8] sm:$0xff] %vm284_vm1, %v700_v46  ;;  %669 = vst.msk [vmem:[#allocation2 + $0x28] sm:$0xff] %vm284_vm1, %v636_v43  ;;  %v641_v51 = vadd.f32 %v1414_v48, %v359_v37  ;;  %v657_v52 = vadd.f32 %v1430_v49, %v375_v42 }
  0xed   : > { %748 = vst.msk [vmem:[%s1737_s8 + $0x88] sm:$0xff] %vm284_vm1, %v716_v47  ;;  %685 = vst.msk [vmem:[#allocation2 + $0xa8] sm:$0xff] %vm284_vm1, %v652_v44  ;;  %v705_v54 = vld [vmem:[#allocation2 + $0x30] sm:$0xff]  ;;  %v536_v56 = vpop.f32.mrf.mxu0  ;;  %v600_v57 = vpop.f32.mrf.mxu1  ;;  %v378_v34 = vld [vmem:[#allocation2 + $0xe8] sm:$0xff] }
  0xee   : > { %v721_v55 = vld [vmem:[#allocation2 + $0xb0] sm:$0xff]  ;;  %737 = vst.msk [vmem:[%s1737_s8 + $0x30] sm:$0xff] %vm284_vm1, %v705_v54  ;;  %674 = vst.msk [vmem:[#allocation2 + $0x50] sm:$0xff] %vm284_vm1, %v641_v51  ;;  %v639_v59 = vadd.f32 %v536_v56, %v357_v45  ;;  %v655_v60 = vadd.f32 %v600_v57, %v373_v50  ;;  %v769_v54 = vld [vmem:[#allocation2 + $0x8] sm:$0xff] (%p763_p5) }
  0xef   : > { %753 = vst.msk [vmem:[%s1737_s8 + $0xb0] sm:$0xff] %vm284_vm1, %v721_v55  ;;  %690 = vst.msk [vmem:[#allocation2 + $0xd0] sm:$0xff] %vm284_vm1, %v657_v52  ;;  %v703_v62 = vld [vmem:[#allocation2 + $0x20] sm:$0xff]  ;;  %v1415_v0 = vpop.f32.mrf.mxu0  ;;  %v1431_v1 = vpop.f32.mrf.mxu1  ;;  %v770_v55 = vld [vmem:[#allocation2 + $0x10] sm:$0xff] (%p763_p5)  ;;  %v801_v57 = vsel (%p763_p5), %vm284_vm1, %v769_v54, 0.0 }
  0xf0   : > { %v719_v63 = vld [vmem:[#allocation2 + $0xa0] sm:$0xff]  ;;  %735 = vst.msk [vmem:[%s1737_s8 + $0x20] sm:$0xff] %vm284_vm1, %v703_v62  ;;  %672 = vst.msk [vmem:[#allocation2 + $0x40] sm:$0xff] %vm284_vm1, %v639_v59  ;;  %v642_v3 = vadd.f32 %v1415_v0, %v360_v53  ;;  %v658_v4 = vadd.f32 %v1431_v1, %v376_v58  ;;  %v803_v58 = vsel (%p763_p5), %vm284_vm1, %v770_v55, 0.0  ;;  %v771_v59 = vld [vmem:[#allocation2 + $0x18] sm:$0xff] (%p763_p5) }
  0xf1   : > { %751 = vst.msk [vmem:[%s1737_s8 + $0xa0] sm:$0xff] %vm284_vm1, %v719_v63  ;;  %688 = vst.msk [vmem:[#allocation2 + $0xc0] sm:$0xff] %vm284_vm1, %v655_v60  ;;  %v706_v6 = vld [vmem:[#allocation2 + $0x38] sm:$0xff]  ;;  %v539_v8 = vpop.f32.mrf.mxu0  ;;  %v603_v9 = vpop.f32.mrf.mxu1  ;;  %v768_v53 = vld [vmem:[#allocation2] sm:$0xff] (%p763_p5) }
  0xf2   : > { %v722_v7 = vld [vmem:[#allocation2 + $0xb8] sm:$0xff]  ;;  %738 = vst.msk [vmem:[%s1737_s8 + $0x38] sm:$0xff] %vm284_vm1, %v706_v6  ;;  %675 = vst.msk [vmem:[#allocation2 + $0x58] sm:$0xff] %vm284_vm1, %v642_v3  ;;  %v640_v11 = vadd.f32 %v539_v8, %v358_v61  ;;  %v656_v12 = vadd.f32 %v603_v9, %v374_v2  ;;  %v800_v56 = vsel (%p763_p5), %vm284_vm1, %v768_v53, 0.0  ;;  %v805_v61 = vsel (%p763_p5), %vm284_vm1, %v771_v59, 0.0  ;;  %v772_v62 = vld [vmem:[#allocation2 + $0x20] sm:$0xff] (%p763_p5) }
  0xf3   : > { %754 = vst.msk [vmem:[%s1737_s8 + $0xb8] sm:$0xff] %vm284_vm1, %v722_v7  ;;  %691 = vst.msk [vmem:[#allocation2 + $0xd8] sm:$0xff] %vm284_vm1, %v658_v4  ;;  %v704_v14 = vld [vmem:[#allocation2 + $0x28] sm:$0xff]  ;;  %v1418_v16 = vpop.f32.mrf.mxu0  ;;  %v1434_v17 = vpop.f32.mrf.mxu1  ;;  %v802_v60 = vadd.f32 (%p763_p5), %v801_v57, %v800_v56  ;;  %v807_v0 = vsel (%p763_p5), %vm284_vm1, %v772_v62, 0.0  ;;  %v774_v4 = vld [vmem:[#allocation2 + $0x30] sm:$0xff] (%p763_p5) }
  0xf4   : > { %v720_v15 = vld [vmem:[#allocation2 + $0xa8] sm:$0xff]  ;;  %736 = vst.msk [vmem:[%s1737_s8 + $0x28] sm:$0xff] %vm284_vm1, %v704_v14  ;;  %673 = vst.msk [vmem:[#allocation2 + $0x48] sm:$0xff] %vm284_vm1, %v640_v11  ;;  %v645_v19 = vadd.f32 %v1418_v16, %v363_v5  ;;  %v661_v20 = vadd.f32 %v1434_v17, %v379_v10  ;;  %v811_v6 = vsel (%p763_p5), %vm284_vm1, %v774_v4, 0.0  ;;  %v775_v7 = vld [vmem:[#allocation2 + $0x38] sm:$0xff] (%p763_p5)  ;;  %v871_v16 = vmul.f32 (%p763_p5), %v768_v53, %v768_v53 }
  0xf5   : > { %752 = vst.msk [vmem:[%s1737_s8 + $0xa8] sm:$0xff] %vm284_vm1, %v720_v15  ;;  %689 = vst.msk [vmem:[#allocation2 + $0xc8] sm:$0xff] %vm284_vm1, %v656_v12  ;;  %v709_v22 = vld [vmem:[#allocation2 + $0x50] sm:$0xff]  ;;  %v552_v24 = vpop.f32.mrf.mxu0  ;;  %v616_v25 = vpop.f32.mrf.mxu1  ;;  %v804_v63 = vadd.f32 (%p763_p5), %v803_v58, %v802_v60  ;;  %v773_v1 = vld [vmem:[#allocation2 + $0x28] sm:$0xff] (%p763_p5)  ;;  %v813_v9 = vsel (%p763_p5), %vm284_vm1, %v775_v7, 0.0  ;;  %v872_v17 = vmul.f32 (%p763_p5), %v769_v54, %v769_v54 }
  0xf6   : > { %v725_v23 = vld [vmem:[#allocation2 + $0xd0] sm:$0xff]  ;;  %741 = vst.msk [vmem:[%s1737_s8 + $0x50] sm:$0xff] %vm284_vm1, %v709_v22  ;;  %678 = vst.msk [vmem:[#allocation2 + $0x70] sm:$0xff] %vm284_vm1, %v645_v19  ;;  %v643_v27 = vadd.f32 %v552_v24, %v361_v13  ;;  %v659_v28 = vadd.f32 %v616_v25, %v377_v18  ;;  %v809_v3 = vsel (%p763_p5), %vm284_vm1, %v773_v1, 0.0  ;;  %v873_v18 = vmul.f32 (%p763_p5), %v770_v55, %v770_v55  ;;  %v784_v54 = vld [vmem:[#allocation2 + $0x80] sm:$0xff] (%p763_p5) }
  0xf7   : > { %757 = vst.msk [vmem:[%s1737_s8 + $0xd0] sm:$0xff] %vm284_vm1, %v725_v23  ;;  %694 = vst.msk [vmem:[#allocation2 + $0xf0] sm:$0xff] %vm284_vm1, %v661_v20  ;;  %v707_v30 = vld [vmem:[#allocation2 + $0x40] sm:$0xff]  ;;  %v1419_v32 = vpop.f32.mrf.mxu0  ;;  %v1435_v33 = vpop.f32.mrf.mxu1  ;;  %v806_v2 = vadd.f32 (%p763_p5), %v805_v61, %v804_v63  ;;  %v778_v19 = vld [vmem:[#allocation2 + $0x50] sm:$0xff] (%p763_p5)  ;;  %v874_v23 = vmul.f32 (%p763_p5), %v771_v59, %v771_v59  ;;  %v831_v57 = vsel (%p763_p5), %vm284_vm1, %v784_v54, 0.0 }
  0xf8   : > { %v723_v31 = vld [vmem:[#allocation2 + $0xc0] sm:$0xff]  ;;  %739 = vst.msk [vmem:[%s1737_s8 + $0x40] sm:$0xff] %vm284_vm1, %v707_v30  ;;  %676 = vst.msk [vmem:[#allocation2 + $0x60] sm:$0xff] %vm284_vm1, %v643_v27  ;;  %v646_v35 = vadd.f32 %v1419_v32, %v364_v21  ;;  %v662_v36 = vadd.f32 %v1435_v33, %v380_v26  ;;  %v819_v22 = vsel (%p763_p5), %vm284_vm1, %v778_v19, 0.0  ;;  %v875_v26 = vmul.f32 (%p763_p5), %v772_v62, %v772_v62  ;;  %v785_v60 = vld [vmem:[#allocation2 + $0x88] sm:$0xff] (%p763_p5) }
  0xf9   : > { %755 = vst.msk [vmem:[%s1737_s8 + $0xc0] sm:$0xff] %vm284_vm1, %v723_v31  ;;  %692 = vst.msk [vmem:[#allocation2 + $0xe0] sm:$0xff] %vm284_vm1, %v659_v28  ;;  %v710_v37 = vld [vmem:[#allocation2 + $0x58] sm:$0xff]  ;;  %v555_v39 = vpop.f32.mrf.mxu0  ;;  %v619_v40 = vpop.f32.mrf.mxu1  ;;  %v808_v5 = vadd.f32 (%p763_p5), %v807_v0, %v806_v2  ;;  %v776_v10 = vld [vmem:[#allocation2 + $0x40] sm:$0xff] (%p763_p5)  ;;  %v903_v27 = vsel (%p763_p5), %vm284_vm1, %v871_v16, 0.0  ;;  %v904_v28 = vsel (%p763_p5), %vm284_vm1, %v872_v17, 0.0  ;;  %v881_v0 = vmul.f32 (%p763_p5), %v778_v19, %v778_v19 }
  0xfa   : > { %v726_v38 = vld [vmem:[#allocation2 + $0xd8] sm:$0xff]  ;;  %742 = vst.msk [vmem:[%s1737_s8 + $0x58] sm:$0xff] %vm284_vm1, %v710_v37  ;;  %679 = vst.msk [vmem:[#allocation2 + $0x78] sm:$0xff] %vm284_vm1, %v646_v35  ;;  %v644_v41 = vadd.f32 %v555_v39, %v362_v29  ;;  %v660_v42 = vadd.f32 %v619_v40, %v378_v34  ;;  %v815_v12 = vsel (%p763_p5), %vm284_vm1, %v776_v10, 0.0  ;;  %v906_v29 = vsel (%p763_p5), %vm284_vm1, %v873_v18, 0.0  ;;  %v786_v2 = vld [vmem:[#allocation2 + $0x90] sm:$0xff] (%p763_p5) }
  0xfb   : > { %758 = vst.msk [vmem:[%s1737_s8 + $0xd8] sm:$0xff] %vm284_vm1, %v726_v38  ;;  %695 = vst.msk [vmem:[#allocation2 + $0xf8] sm:$0xff] %vm284_vm1, %v662_v36  ;;  %v708_v43 = vld [vmem:[#allocation2 + $0x48] sm:$0xff]  ;;  %v810_v8 = vadd.f32 (%p763_p5), %v809_v3, %v808_v5  ;;  %v779_v21 = vld [vmem:[#allocation2 + $0x58] sm:$0xff] (%p763_p5)  ;;  %v905_v32 = vadd.f32 (%p763_p5), %v904_v28, %v903_v27  ;;  %v876_v34 = vmul.f32 (%p763_p5), %v773_v1, %v773_v1  ;;  %v908_v35 = vsel (%p763_p5), %vm284_vm1, %v874_v23, 0.0 }
  0xfc   : > { %v724_v44 = vld [vmem:[#allocation2 + $0xc8] sm:$0xff]  ;;  %740 = vst.msk [vmem:[%s1737_s8 + $0x48] sm:$0xff] %vm284_vm1, %v708_v43  ;;  %677 = vst.msk [vmem:[#allocation2 + $0x68] sm:$0xff] %vm284_vm1, %v644_v41  ;;  %v821_v25 = vsel (%p763_p5), %vm284_vm1, %v779_v21, 0.0  ;;  %v877_v40 = vmul.f32 (%p763_p5), %v774_v4, %v774_v4  ;;  %v910_v41 = vsel (%p763_p5), %vm284_vm1, %v875_v26, 0.0  ;;  %v833_v63 = vsel (%p763_p5), %vm284_vm1, %v785_v60, 0.0 }
  0xfd   : > { %756 = vst.msk [vmem:[%s1737_s8 + $0xc8] sm:$0xff] %vm284_vm1, %v724_v44  ;;  %693 = vst.msk [vmem:[#allocation2 + $0xe8] sm:$0xff] %vm284_vm1, %v660_v42  ;;  %v713_v45 = vld [vmem:[#allocation2 + $0x70] sm:$0xff]  ;;  %v812_v11 = vadd.f32 (%p763_p5), %v811_v6, %v810_v8  ;;  %v777_v13 = vld [vmem:[#allocation2 + $0x48] sm:$0xff] (%p763_p5)  ;;  %v907_v38 = vadd.f32 (%p763_p5), %v906_v29, %v905_v32  ;;  %v835_v5 = vsel (%p763_p5), %vm284_vm1, %v786_v2, 0.0  ;;  %v882_v6 = vmul.f32 (%p763_p5), %v779_v21, %v779_v21 }
  0xfe   : > { %v729_v46 = vld [vmem:[#allocation2 + $0xf0] sm:$0xff]  ;;  %745 = vst.msk [vmem:[%s1737_s8 + $0x70] sm:$0xff] %vm284_vm1, %v713_v45  ;;  %v817_v15 = vsel (%p763_p5), %vm284_vm1, %v777_v13, 0.0  ;;  %v914_v53 = vsel (%p763_p5), %vm284_vm1, %v877_v40, 0.0  ;;  %v880_v58 = vmul.f32 (%p763_p5), %v777_v13, %v777_v13  ;;  %v787_v8 = vld [vmem:[#allocation2 + $0x98] sm:$0xff] (%p763_p5)  ;;  %v922_v13 = vsel (%p763_p5), %vm284_vm1, %v881_v0, 0.0 }
  0xff   : > { %761 = vst.msk [vmem:[%s1737_s8 + $0xf0] sm:$0xff] %vm284_vm1, %v729_v46  ;;  %v711_v47 = vld [vmem:[#allocation2 + $0x60] sm:$0xff]  ;;  %v814_v14 = vadd.f32 (%p763_p5), %v813_v9, %v812_v11  ;;  %v782_v42 = vld [vmem:[#allocation2 + $0x70] sm:$0xff] (%p763_p5)  ;;  %v909_v44 = vadd.f32 (%p763_p5), %v908_v35, %v907_v38  ;;  %v878_v46 = vmul.f32 (%p763_p5), %v775_v7, %v775_v7  ;;  %v837_v11 = vsel (%p763_p5), %vm284_vm1, %v787_v8, 0.0  ;;  %v791_v32 = vld [vmem:[#allocation2 + $0xb8] sm:$0xff] (%p763_p5) }
 0x100   : > { %v727_v48 = vld [vmem:[#allocation2 + $0xe0] sm:$0xff]  ;;  %743 = vst.msk [vmem:[%s1737_s8 + $0x60] sm:$0xff] %vm284_vm1, %v711_v47  ;;  %v827_v45 = vsel (%p763_p5), %vm284_vm1, %v782_v42, 0.0  ;;  %v912_v47 = vsel (%p763_p5), %vm284_vm1, %v876_v34, 0.0  ;;  %v920_v7 = vsel (%p763_p5), %vm284_vm1, %v880_v58, 0.0  ;;  %v924_v19 = vsel (%p763_p5), %vm284_vm1, %v882_v6, 0.0 }
 0x101   : > { %759 = vst.msk [vmem:[%s1737_s8 + $0xe0] sm:$0xff] %vm284_vm1, %v727_v48  ;;  %v714_v49 = vld [vmem:[#allocation2 + $0x78] sm:$0xff]  ;;  %767 = sbr.rel (!%p763_p5) target bundleno = 328 (0x148), region = 40  ;;  %v816_v20 = vadd.f32 (%p763_p5), %v815_v12, %v814_v14  ;;  %v780_v30 = vld [vmem:[#allocation2 + $0x60] sm:$0xff] (%p763_p5)  ;;  %v916_v59 = vsel (%p763_p5), %vm284_vm1, %v878_v46, 0.0  ;;  %v790_v26 = vld [vmem:[#allocation2 + $0xb0] sm:$0xff] (%p763_p5) }
 0x102   : > { %v730_v50 = vld [vmem:[#allocation2 + $0xf8] sm:$0xff]  ;;  %746 = vst.msk [vmem:[%s1737_s8 + $0x78] sm:$0xff] %vm284_vm1, %v714_v49  ;;  %v823_v33 = vsel (%p763_p5), %vm284_vm1, %v780_v30, 0.0  ;;  %v883_v12 = vmul.f32 (%p763_p5), %v780_v30, %v780_v30  ;;  %v788_v14 = vld [vmem:[#allocation2 + $0xa0] sm:$0xff] (%p763_p5)  ;;  %v843_v29 = vsel (%p763_p5), %vm284_vm1, %v790_v26, 0.0  ;;  %v845_v35 = vsel (%p763_p5), %vm284_vm1, %v791_v32, 0.0 }
 0x103   : > { %762 = vst.msk [vmem:[%s1737_s8 + $0xf8] sm:$0xff] %vm284_vm1, %v730_v50  ;;  %v712_v51 = vld [vmem:[#allocation2 + $0x68] sm:$0xff]  ;;  %v818_v24 = vadd.f32 (%p763_p5), %v817_v15, %v816_v20  ;;  %v783_v48 = vld [vmem:[#allocation2 + $0x78] sm:$0xff] (%p763_p5)  ;;  %v911_v50 = vadd.f32 (%p763_p5), %v910_v41, %v909_v44  ;;  %v839_v17 = vsel (%p763_p5), %vm284_vm1, %v788_v14, 0.0  ;;  %v792_v38 = vld [vmem:[#allocation2 + $0xc0] sm:$0xff] (%p763_p5) }
 0x104   : > { %v728_v52 = vld [vmem:[#allocation2 + $0xe8] sm:$0xff]  ;;  %744 = vst.msk [vmem:[%s1737_s8 + $0x68] sm:$0xff] %vm284_vm1, %v712_v51  ;;  %v829_v51 = vsel (%p763_p5), %vm284_vm1, %v783_v48, 0.0  ;;  %v886_v30 = vmul.f32 (%p763_p5), %v783_v48, %v783_v48  ;;  %v847_v41 = vsel (%p763_p5), %vm284_vm1, %v792_v38, 0.0  ;;  %v889_v48 = vmul.f32 (%p763_p5), %v786_v2, %v786_v2 }
 0x105   : > { %760 = vst.msk [vmem:[%s1737_s8 + $0xe8] sm:$0xff] %vm284_vm1, %v728_v52  ;;  %v820_v31 = vadd.f32 (%p763_p5), %v819_v22, %v818_v24  ;;  %v781_v36 = vld [vmem:[#allocation2 + $0x68] sm:$0xff] (%p763_p5)  ;;  %v879_v52 = vmul.f32 (%p763_p5), %v776_v10, %v776_v10  ;;  %v913_v56 = vadd.f32 (%p763_p5), %v912_v47, %v911_v50  ;;  %v885_v24 = vmul.f32 (%p763_p5), %v782_v42, %v782_v42  ;;  %v794_v50 = vld [vmem:[#allocation2 + $0xd0] sm:$0xff] (%p763_p5) }
 0x106   : > { %v825_v39 = vsel %vm284_vm1, %v781_v36, 0.0  ;;  %v884_v18 = vmul.f32 %v781_v36, %v781_v36  ;;  %v789_v20 = vld [vmem:[#allocation2 + $0xa8] sm:$0xff]  ;;  %v887_v36 = vmul.f32 %v784_v54, %v784_v54  ;;  %v888_v42 = vmul.f32 %v785_v60, %v785_v60 }
 0x107   : > { %v822_v37 = vadd.f32 %v821_v25, %v820_v31  ;;  %v915_v62 = vadd.f32 %v914_v53, %v913_v56  ;;  %v918_v1 = vsel %vm284_vm1, %v879_v52, 0.0  ;;  %v841_v23 = vsel %vm284_vm1, %v789_v20, 0.0  ;;  %v793_v44 = vld [vmem:[#allocation2 + $0xc8] sm:$0xff]  ;;  %v795_v56 = vld [vmem:[#allocation2 + $0xd8] sm:$0xff] }
 0x108   : > { %v926_v25 = vsel %vm284_vm1, %v883_v12, 0.0  ;;  %v928_v31 = vsel %vm284_vm1, %v884_v18, 0.0  ;;  %v849_v47 = vsel %vm284_vm1, %v793_v44, 0.0  ;;  %v851_v53 = vsel %vm284_vm1, %v794_v50, 0.0 }
 0x109   : > { %v824_v43 = vadd.f32 %v823_v33, %v822_v37  ;;  %v917_v4 = vadd.f32 %v916_v59, %v915_v62  ;;  %v930_v37 = vsel %vm284_vm1, %v885_v24, 0.0  ;;  %v890_v54 = vmul.f32 %v787_v8, %v787_v8  ;;  %v796_v62 = vld [vmem:[#allocation2 + $0xe0] sm:$0xff] }
 0x10a   : > { %v853_v59 = vsel %vm284_vm1, %v795_v56, 0.0  ;;  %v891_v60 = vmul.f32 %v788_v14, %v788_v14  ;;  %v892_v2 = vmul.f32 %v789_v20, %v789_v20  ;;  %v893_v8 = vmul.f32 %v790_v26, %v790_v26 }
 0x10b   : > { %v826_v49 = vadd.f32 %v825_v39, %v824_v43  ;;  %v919_v10 = vadd.f32 %v918_v1, %v917_v4  ;;  %v932_v43 = vsel %vm284_vm1, %v886_v30, 0.0  ;;  %v855_v1 = vsel %vm284_vm1, %v796_v62, 0.0  ;;  %v797_v4 = vld [vmem:[#allocation2 + $0xe8] sm:$0xff] }
 0x10c   : > { %v894_v14 = vmul.f32 %v791_v32, %v791_v32  ;;  %v895_v20 = vmul.f32 %v792_v38, %v792_v38  ;;  %v896_v24 = vmul.f32 %v793_v44, %v793_v44  ;;  %v898_v32 = vmul.f32 %v795_v56, %v795_v56 }
 0x10d   : > { %v828_v55 = vadd.f32 %v827_v45, %v826_v49  ;;  %v921_v16 = vadd.f32 %v920_v7, %v919_v10  ;;  %v934_v49 = vsel %vm284_vm1, %v887_v36, 0.0  ;;  %v857_v7 = vsel %vm284_vm1, %v797_v4, 0.0  ;;  %v798_v10 = vld [vmem:[#allocation2 + $0xf0] sm:$0xff] }
 0x10e   : > { %v899_v36 = vmul.f32 %v796_v62, %v796_v62  ;;  %v901_v44 = vmul.f32 %v798_v10, %v798_v10 }
 0x10f   : > { %v830_v61 = vadd.f32 %v829_v51, %v828_v55  ;;  %v923_v22 = vadd.f32 %v922_v13, %v921_v16  ;;  %v936_v55 = vsel %vm284_vm1, %v888_v42, 0.0  ;;  %v859_v13 = vsel %vm284_vm1, %v798_v10, 0.0  ;;  %v799_v16 = vld [vmem:[#allocation2 + $0xf8] sm:$0xff] }
 0x111   : > { %v832_v3 = vadd.f32 %v831_v57, %v830_v61  ;;  %v925_v28 = vadd.f32 %v924_v19, %v923_v22  ;;  %v938_v61 = vsel %vm284_vm1, %v889_v48, 0.0  ;;  %v861_v19 = vsel %vm284_vm1, %v799_v16, 0.0 }
 0x112   : > { %v902_v48 = vmul.f32 %v799_v16, %v799_v16 }
 0x113   : > { %v834_v9 = vadd.f32 %v833_v63, %v832_v3  ;;  %v927_v34 = vadd.f32 %v926_v25, %v925_v28  ;;  %v940_v3 = vsel %vm284_vm1, %v890_v54, 0.0  ;;  %v948_v25 = vsel %vm284_vm1, %v894_v14, 0.0 }
 0x114   : > { %v897_v28 = vmul.f32 %v794_v50, %v794_v50  ;;  %v964_v54 = vsel %vm284_vm1, %v902_v48, 0.0 }
 0x115   : > { %v836_v15 = vadd.f32 %v835_v5, %v834_v9  ;;  %v929_v40 = vadd.f32 %v928_v31, %v927_v34  ;;  %v942_v9 = vsel %vm284_vm1, %v891_v60, 0.0 }
 0x117   : > { %v838_v21 = vadd.f32 %v837_v11, %v836_v15  ;;  %v931_v46 = vadd.f32 %v930_v37, %v929_v40  ;;  %v944_v15 = vsel %vm284_vm1, %v892_v2, 0.0  ;;  %v954_v37 = vsel %vm284_vm1, %v897_v28, 0.0 }
 0x118   : > { %v900_v40 = vmul.f32 %v797_v4, %v797_v4 }
 0x119   : > { %v840_v27 = vadd.f32 %v839_v17, %v838_v21  ;;  %v933_v52 = vadd.f32 %v932_v43, %v931_v46  ;;  %v946_v21 = vsel %vm284_vm1, %v893_v8, 0.0 }
 0x11b   : > { %v842_v33 = vadd.f32 %v841_v23, %v840_v27  ;;  %v935_v58 = vadd.f32 %v934_v49, %v933_v52  ;;  %v960_v49 = vsel %vm284_vm1, %v900_v40, 0.0  ;;  %v962_v52 = vsel %vm284_vm1, %v901_v44, 0.0 }
 0x11d   : > { %v844_v39 = vadd.f32 %v843_v29, %v842_v33  ;;  %v937_v0 = vadd.f32 %v936_v55, %v935_v58  ;;  %v950_v29 = vsel %vm284_vm1, %v895_v20, 0.0  ;;  %v952_v33 = vsel %vm284_vm1, %v896_v24, 0.0 }
 0x11f   : > { %v846_v45 = vadd.f32 %v845_v35, %v844_v39  ;;  %v939_v6 = vadd.f32 %v938_v61, %v937_v0 }
 0x121   : > { %v848_v51 = vadd.f32 %v847_v41, %v846_v45  ;;  %v941_v12 = vadd.f32 %v940_v3, %v939_v6  ;;  %v956_v41 = vsel %vm284_vm1, %v898_v32, 0.0  ;;  %v958_v45 = vsel %vm284_vm1, %v899_v36, 0.0 }
 0x123   : > { %v850_v57 = vadd.f32 %v849_v47, %v848_v51  ;;  %v943_v18 = vadd.f32 %v942_v9, %v941_v12 }
 0x125   : > { %v852_v63 = vadd.f32 %v851_v53, %v850_v57  ;;  %v945_v23 = vadd.f32 %v944_v15, %v943_v18 }
 0x127   : > { %v854_v5 = vadd.f32 %v853_v59, %v852_v63  ;;  %v947_v27 = vadd.f32 %v946_v21, %v945_v23 }
 0x129   : > { %v856_v11 = vadd.f32 %v855_v1, %v854_v5  ;;  %v949_v31 = vadd.f32 %v948_v25, %v947_v27 }
 0x12b   : > { %v858_v17 = vadd.f32 %v857_v7, %v856_v11  ;;  %v951_v35 = vadd.f32 %v950_v29, %v949_v31 }
 0x12d   : > { %v860_v22 = vadd.f32 %v859_v13, %v858_v17  ;;  %v953_v39 = vadd.f32 %v952_v33, %v951_v35 }
 0x12f   : > { %v862_v26 = vadd.f32 %v861_v19, %v860_v22  ;;  %v955_v43 = vadd.f32 %v954_v37, %v953_v39 }
 0x131   : > { %v863_v30 = vrot.slane %v862_v26, 4  ;;  %v957_v47 = vadd.f32 %v956_v41, %v955_v43 }
 0x133   : > { %v864_v34 = vadd.f32 %v863_v30, %v862_v26  ;;  %v959_v51 = vadd.f32 %v958_v45, %v957_v47 }
 0x135   : > { %v865_v38 = vrot.slane %v864_v34, 2  ;;  %v961_v53 = vadd.f32 %v960_v49, %v959_v51 }
 0x137   : > { %v866_v42 = vadd.f32 %v865_v38, %v864_v34  ;;  %v963_v55 = vadd.f32 %v962_v52, %v961_v53 }
 0x139   : > { %v867_v46 = vrot.slane %v866_v42, 1  ;;  %v965_v56 = vadd.f32 %v964_v54, %v963_v55 }
 0x13b   : > { %v868_v50 = vadd.f32 %v867_v46, %v866_v42  ;;  %v966_v57 = vrot.slane %v965_v56, 4 }
 0x13d   : > { %870 = vst.msk [vmem:[#allocation3] sm:$0x1] %vm869_vm3, %v868_v50  ;;  %v967_v58 = vadd.f32 %v966_v57, %v965_v56 }
 0x13f   : > { %v968_v59 = vrot.slane %v967_v58, 2 }
 0x141   : > { %v969_v60 = vadd.f32 %v968_v59, %v967_v58 }
 0x143   : > { %v970_v61 = vrot.slane %v969_v60, 1 }
 0x145   : > { %v971_v62 = vadd.f32 %v970_v61, %v969_v60 }
 0x147   : > { %972 = vst.msk [vmem:[#allocation5] sm:$0x1] %vm869_vm3, %v971_v62 }
 0x148 PF: > { %p973_p6 = scmp.gt.s32.totalorder %s1556_s15, 0 }
 0x149   : > { %v978_v63 = vld [vmem:[#allocation2] sm:$0xff] (%p973_p6)  ;;  %v979_v0 = vld [vmem:[#allocation2 + $0x8] sm:$0xff] (%p973_p6)  ;;  %v980_v1 = vld [vmem:[#allocation2 + $0x10] sm:$0xff] (%p973_p6)  ;;  %vm1081_vm4 = vcmask (%p973_p6), 188416  }
 0x14a   : > { %977 = sbr.rel (!%p973_p6) target bundleno = 413 (0x19d), region = 44  ;;  %v1011_v2 = vsel (%p973_p6), %vm284_vm1, %v978_v63, 0.0  ;;  %v1012_v3 = vsel (%p973_p6), %vm284_vm1, %v979_v0, 0.0  ;;  %v1014_v4 = vsel (%p973_p6), %vm284_vm1, %v980_v1, 0.0  ;;  %v981_v5 = vld [vmem:[#allocation2 + $0x18] sm:$0xff] (%p973_p6)  ;;  %v982_v8 = vld [vmem:[#allocation2 + $0x20] sm:$0xff] (%p973_p6)  ;;  %v1084_v26 = vmul.f32 (%p973_p6), %v978_v63, %v978_v63 }
 0x14b   : > { %v1013_v6 = vadd.f32 (%p973_p6), %v1012_v3, %v1011_v2  ;;  %v1016_v7 = vsel (%p973_p6), %vm284_vm1, %v981_v5, 0.0  ;;  %v1018_v10 = vsel (%p973_p6), %vm284_vm1, %v982_v8, 0.0  ;;  %v983_v11 = vld [vmem:[#allocation2 + $0x28] sm:$0xff] (%p973_p6)  ;;  %v984_v14 = vld [vmem:[#allocation2 + $0x30] sm:$0xff] (%p973_p6)  ;;  %v985_v17 = vld [vmem:[#allocation2 + $0x38] sm:$0xff] (%p973_p6)  ;;  %v1085_v27 = vmul.f32 (%p973_p6), %v979_v0, %v979_v0 }
 0x14c   : > { %v1020_v13 = vsel (%p973_p6), %vm284_vm1, %v983_v11, 0.0  ;;  %v1022_v16 = vsel (%p973_p6), %vm284_vm1, %v984_v14, 0.0  ;;  %v1024_v19 = vsel (%p973_p6), %vm284_vm1, %v985_v17, 0.0  ;;  %v986_v20 = vld [vmem:[#allocation2 + $0x40] sm:$0xff] (%p973_p6)  ;;  %v987_v23 = vld [vmem:[#allocation2 + $0x48] sm:$0xff] (%p973_p6)  ;;  %v1086_v28 = vmul.f32 (%p973_p6), %v980_v1, %v980_v1  ;;  %v988_v29 = vld [vmem:[#allocation2 + $0x50] sm:$0xff] (%p973_p6) }
 0x14d   : > { %v1015_v9 = vadd.f32 (%p973_p6), %v1014_v4, %v1013_v6  ;;  %v1026_v22 = vsel (%p973_p6), %vm284_vm1, %v986_v20, 0.0  ;;  %v1028_v25 = vsel (%p973_p6), %vm284_vm1, %v987_v23, 0.0  ;;  %v989_v31 = vld [vmem:[#allocation2 + $0x58] sm:$0xff] (%p973_p6)  ;;  %v1030_v32 = vsel (%p973_p6), %vm284_vm1, %v988_v29, 0.0  ;;  %v990_v40 = vld [vmem:[#allocation2 + $0x60] sm:$0xff] (%p973_p6)  ;;  %v991_v46 = vld [vmem:[#allocation2 + $0x68] sm:$0xff] (%p973_p6) }
 0x14e   : > { %v1087_v33 = vmul.f32 (%p973_p6), %v981_v5, %v981_v5  ;;  %v1032_v35 = vsel (%p973_p6), %vm284_vm1, %v989_v31, 0.0  ;;  %v1088_v36 = vmul.f32 (%p973_p6), %v982_v8, %v982_v8  ;;  %v1116_v37 = vsel (%p973_p6), %vm284_vm1, %v1084_v26, 0.0  ;;  %v992_v52 = vld [vmem:[#allocation2 + $0x70] sm:$0xff] (%p973_p6)  ;;  %v993_v58 = vld [vmem:[#allocation2 + $0x78] sm:$0xff] (%p973_p6)  ;;  %v994_v0 = vld [vmem:[#allocation2 + $0x80] sm:$0xff] (%p973_p6) }
 0x14f   : > { %v1017_v12 = vadd.f32 %v1016_v7, %v1015_v9  ;;  %v1117_v38 = vsel %vm284_vm1, %v1085_v27, 0.0  ;;  %v1119_v39 = vsel %vm284_vm1, %v1086_v28, 0.0  ;;  %v1034_v43 = vsel %vm284_vm1, %v990_v40, 0.0  ;;  %v995_v6 = vld [vmem:[#allocation2 + $0x88] sm:$0xff] }
 0x150   : > { %v1118_v42 = vadd.f32 %v1117_v38, %v1116_v37  ;;  %v1089_v44 = vmul.f32 %v983_v11, %v983_v11  ;;  %v1121_v45 = vsel %vm284_vm1, %v1087_v33, 0.0  ;;  %v1036_v49 = vsel %vm284_vm1, %v991_v46, 0.0 }
 0x151   : > { %v1019_v15 = vadd.f32 %v1018_v10, %v1017_v12  ;;  %v1090_v50 = vmul.f32 %v984_v14, %v984_v14  ;;  %v1123_v51 = vsel %vm284_vm1, %v1088_v36, 0.0  ;;  %v1038_v55 = vsel %vm284_vm1, %v992_v52, 0.0  ;;  %v996_v12 = vld [vmem:[#allocation2 + $0x90] sm:$0xff] }
 0x152   : > { %v1120_v48 = vadd.f32 %v1119_v39, %v1118_v42  ;;  %v1091_v56 = vmul.f32 %v985_v17, %v985_v17  ;;  %v1125_v57 = vsel %vm284_vm1, %v1089_v44, 0.0  ;;  %v1040_v61 = vsel %vm284_vm1, %v993_v58, 0.0  ;;  %v1000_v36 = vld [vmem:[#allocation2 + $0xb0] sm:$0xff]  ;;  %v1001_v42 = vld [vmem:[#allocation2 + $0xb8] sm:$0xff] }
 0x153   : > { %v1021_v18 = vadd.f32 %v1020_v13, %v1019_v15  ;;  %v1092_v62 = vmul.f32 %v986_v20, %v986_v20  ;;  %v1127_v63 = vsel %vm284_vm1, %v1090_v50, 0.0  ;;  %v1042_v3 = vsel %vm284_vm1, %v994_v0, 0.0 }
 0x154   : > { %v1122_v54 = vadd.f32 %v1121_v45, %v1120_v48  ;;  %v1093_v4 = vmul.f32 %v987_v23, %v987_v23  ;;  %v1129_v5 = vsel %vm284_vm1, %v1091_v56, 0.0  ;;  %v1044_v9 = vsel %vm284_vm1, %v995_v6, 0.0  ;;  %v1002_v48 = vld [vmem:[#allocation2 + $0xc0] sm:$0xff] }
 0x155   : > { %v1023_v21 = vadd.f32 %v1022_v16, %v1021_v18  ;;  %v1094_v10 = vmul.f32 %v988_v29, %v988_v29  ;;  %v1131_v11 = vsel %vm284_vm1, %v1092_v62, 0.0  ;;  %v1046_v15 = vsel %vm284_vm1, %v996_v12, 0.0  ;;  %v997_v18 = vld [vmem:[#allocation2 + $0x98] sm:$0xff] }
 0x156   : > { %v1124_v60 = vadd.f32 %v1123_v51, %v1122_v54  ;;  %v1095_v16 = vmul.f32 %v989_v31, %v989_v31  ;;  %v1133_v17 = vsel %vm284_vm1, %v1093_v4, 0.0  ;;  %v1097_v28 = vmul.f32 %v991_v46, %v991_v46  ;;  %v1003_v54 = vld [vmem:[#allocation2 + $0xc8] sm:$0xff] }
 0x157   : > { %v1025_v24 = vadd.f32 %v1024_v19, %v1023_v21  ;;  %v1048_v21 = vsel %vm284_vm1, %v997_v18, 0.0  ;;  %v1135_v23 = vsel %vm284_vm1, %v1094_v10, 0.0  ;;  %v1054_v39 = vsel %vm284_vm1, %v1000_v36, 0.0 }
 0x158   : > { %v1126_v2 = vadd.f32 %v1125_v57, %v1124_v60  ;;  %v1137_v29 = vsel %vm284_vm1, %v1095_v16, 0.0  ;;  %v1056_v45 = vsel %vm284_vm1, %v1001_v42, 0.0  ;;  %v1100_v46 = vmul.f32 %v994_v0, %v994_v0  ;;  %v1004_v60 = vld [vmem:[#allocation2 + $0xd0] sm:$0xff] }
 0x159   : > { %v1027_v30 = vadd.f32 %v1026_v22, %v1025_v24  ;;  %v1096_v22 = vmul.f32 %v990_v40, %v990_v40  ;;  %v998_v24 = vld [vmem:[#allocation2 + $0xa0] sm:$0xff]  ;;  %v1099_v40 = vmul.f32 %v993_v58, %v993_v58  ;;  %v1058_v51 = vsel %vm284_vm1, %v1002_v48, 0.0 }
 0x15a   : > { %v1128_v8 = vadd.f32 %v1127_v63, %v1126_v2  ;;  %v1050_v27 = vsel %vm284_vm1, %v998_v24, 0.0  ;;  %v1060_v57 = vsel %vm284_vm1, %v1003_v54, 0.0  ;;  %v1102_v58 = vmul.f32 %v996_v12, %v996_v12  ;;  %v1005_v2 = vld [vmem:[#allocation2 + $0xd8] sm:$0xff] }
 0x15b   : > { %v1029_v34 = vadd.f32 %v1028_v25, %v1027_v30  ;;  %v999_v30 = vld [vmem:[#allocation2 + $0xa8] sm:$0xff]  ;;  %v1062_v63 = vsel %vm284_vm1, %v1004_v60, 0.0  ;;  %v1103_v0 = vmul.f32 %v997_v18, %v997_v18  ;;  %v1106_v18 = vmul.f32 %v1000_v36, %v1000_v36 }
 0x15c   : > { %v1130_v14 = vadd.f32 %v1129_v5, %v1128_v8  ;;  %v1052_v33 = vsel %vm284_vm1, %v999_v30, 0.0  ;;  %v1064_v5 = vsel %vm284_vm1, %v1005_v2, 0.0  ;;  %v1006_v8 = vld [vmem:[#allocation2 + $0xe0] sm:$0xff]  ;;  %v1105_v12 = vmul.f32 %v999_v30, %v999_v30 }
 0x15d   : > { %v1031_v41 = vadd.f32 %v1030_v32, %v1029_v34  ;;  %v1098_v34 = vmul.f32 %v992_v52, %v992_v52  ;;  %v1101_v52 = vmul.f32 %v995_v6, %v995_v6  ;;  %v1104_v6 = vmul.f32 %v998_v24, %v998_v24 }
 0x15e   : > { %v1132_v20 = vadd.f32 %v1131_v11, %v1130_v14  ;;  %v1066_v11 = vsel %vm284_vm1, %v1006_v8, 0.0  ;;  %v1007_v14 = vld [vmem:[#allocation2 + $0xe8] sm:$0xff]  ;;  %v1107_v24 = vmul.f32 %v1001_v42, %v1001_v42  ;;  %v1108_v30 = vmul.f32 %v1002_v48, %v1002_v48 }
 0x15f   : > { %v1033_v47 = vadd.f32 %v1032_v35, %v1031_v41  ;;  %v1139_v35 = vsel %vm284_vm1, %v1096_v22, 0.0  ;;  %v1141_v41 = vsel %vm284_vm1, %v1097_v28, 0.0  ;;  %v1111_v42 = vmul.f32 %v1005_v2, %v1005_v2 }
 0x160   : > { %v1134_v26 = vadd.f32 %v1133_v17, %v1132_v20  ;;  %v1068_v17 = vsel %vm284_vm1, %v1007_v14, 0.0  ;;  %v1008_v20 = vld [vmem:[#allocation2 + $0xf0] sm:$0xff] }
 0x161   : > { %v1035_v53 = vadd.f32 %v1034_v43, %v1033_v47  ;;  %v1143_v47 = vsel %vm284_vm1, %v1098_v34, 0.0  ;;  %v1109_v34 = vmul.f32 %v1003_v54, %v1003_v54  ;;  %v1114_v54 = vmul.f32 %v1008_v20, %v1008_v20 }
 0x162   : > { %v1136_v32 = vadd.f32 %v1135_v23, %v1134_v26  ;;  %v1070_v23 = vsel %vm284_vm1, %v1008_v20, 0.0  ;;  %v1009_v26 = vld [vmem:[#allocation2 + $0xf8] sm:$0xff] }
 0x163   : > { %v1037_v59 = vadd.f32 %v1036_v49, %v1035_v53  ;;  %v1145_v53 = vsel %vm284_vm1, %v1099_v40, 0.0 }
 0x164   : > { %v1138_v38 = vadd.f32 %v1137_v29, %v1136_v32  ;;  %v1072_v29 = vsel %vm284_vm1, %v1009_v26, 0.0 }
 0x165   : > { %v1039_v1 = vadd.f32 %v1038_v55, %v1037_v59  ;;  %v1147_v59 = vsel %vm284_vm1, %v1100_v46, 0.0  ;;  %v1112_v46 = vmul.f32 %v1006_v8, %v1006_v8 }
 0x166   : > { %v1140_v44 = vadd.f32 %v1139_v35, %v1138_v38  ;;  %v1161_v35 = vsel %vm284_vm1, %v1107_v24, 0.0  ;;  %v1110_v38 = vmul.f32 %v1004_v60, %v1004_v60 }
 0x167   : > { %v1041_v7 = vadd.f32 %v1040_v61, %v1039_v1  ;;  %v1149_v1 = vsel %vm284_vm1, %v1101_v52, 0.0 }
 0x168   : > { %v1142_v50 = vadd.f32 %v1141_v41, %v1140_v44 }
 0x169   : > { %v1043_v13 = vadd.f32 %v1042_v3, %v1041_v7  ;;  %v1151_v7 = vsel %vm284_vm1, %v1102_v58, 0.0  ;;  %v1010_v58 = vld [vmem:[#allocation3] sm:$0x1] }
 0x16a   : > { %v1144_v56 = vadd.f32 %v1143_v47, %v1142_v50  ;;  %v1167_v47 = vsel %vm284_vm1, %v1110_v38, 0.0  ;;  %v1113_v50 = vmul.f32 %v1007_v14, %v1007_v14 }
 0x16b   : > { %v1045_v19 = vadd.f32 %v1044_v9, %v1043_v13  ;;  %v1153_v13 = vsel %vm284_vm1, %v1103_v0, 0.0 }
 0x16c   : > { %v1146_v62 = vadd.f32 %v1145_v53, %v1144_v56  ;;  %v1173_v60 = vsel %vm284_vm1, %v1113_v50, 0.0 }
 0x16d   : > { %v1047_v25 = vadd.f32 %v1046_v15, %v1045_v19  ;;  %v1155_v19 = vsel %vm284_vm1, %v1104_v6, 0.0 }
 0x16e   : > { %v1148_v4 = vadd.f32 %v1147_v59, %v1146_v62  ;;  %v1115_v59 = vmul.f32 %v1009_v26, %v1009_v26 }
 0x16f   : > { %v1049_v31 = vadd.f32 %v1048_v21, %v1047_v25  ;;  %v1157_v25 = vsel %vm284_vm1, %v1105_v12, 0.0 }
 0x170   : > { %v1150_v10 = vadd.f32 %v1149_v1, %v1148_v4  ;;  %v1177_v2 = vsel %vm284_vm1, %v1115_v59, 0.0 }
 0x171   : > { %v1051_v37 = vadd.f32 %v1050_v27, %v1049_v31  ;;  %v1159_v31 = vsel %vm284_vm1, %v1106_v18, 0.0 }
 0x172   : > { %v1152_v16 = vadd.f32 %v1151_v7, %v1150_v10  ;;  %v1083_v10 = vld [vmem:[#allocation5] sm:$0x1] }
 0x173   : > { %v1053_v43 = vadd.f32 %v1052_v33, %v1051_v37 }
 0x174   : > { %v1154_v22 = vadd.f32 %v1153_v13, %v1152_v16 }
 0x175   : > { %v1055_v49 = vadd.f32 %v1054_v39, %v1053_v43  ;;  %v1163_v39 = vsel %vm284_vm1, %v1108_v30, 0.0  ;;  %v1165_v43 = vsel %vm284_vm1, %v1109_v34, 0.0 }
 0x176   : > { %v1156_v28 = vadd.f32 %v1155_v19, %v1154_v22 }
 0x177   : > { %v1057_v55 = vadd.f32 %v1056_v45, %v1055_v49 }
 0x178   : > { %v1158_v33 = vadd.f32 %v1157_v25, %v1156_v28 }
 0x179   : > { %v1059_v61 = vadd.f32 %v1058_v51, %v1057_v55  ;;  %v1169_v51 = vsel %vm284_vm1, %v1111_v42, 0.0  ;;  %v1171_v55 = vsel %vm284_vm1, %v1112_v46, 0.0 }
 0x17a   : > { %v1160_v37 = vadd.f32 %v1159_v31, %v1158_v33 }
 0x17b   : > { %v1061_v3 = vadd.f32 %v1060_v57, %v1059_v61 }
 0x17c   : > { %v1162_v41 = vadd.f32 %v1161_v35, %v1160_v37 }
 0x17d   : > { %v1063_v9 = vadd.f32 %v1062_v63, %v1061_v3  ;;  %v1175_v63 = vsel %vm284_vm1, %v1114_v54, 0.0 }
 0x17e   : > { %v1164_v45 = vadd.f32 %v1163_v39, %v1162_v41 }
 0x17f   : > { %v1065_v15 = vadd.f32 %v1064_v5, %v1063_v9 }
 0x180   : > { %v1166_v49 = vadd.f32 %v1165_v43, %v1164_v45 }
 0x181   : > { %v1067_v21 = vadd.f32 %v1066_v11, %v1065_v15 }
 0x182   : > { %v1168_v53 = vadd.f32 %v1167_v47, %v1166_v49 }
 0x183   : > { %v1069_v27 = vadd.f32 %v1068_v17, %v1067_v21 }
 0x184   : > { %v1170_v57 = vadd.f32 %v1169_v51, %v1168_v53 }
 0x185   : > { %v1071_v32 = vadd.f32 %v1070_v23, %v1069_v27 }
 0x186   : > { %v1172_v62 = vadd.f32 %v1171_v55, %v1170_v57 }
 0x187   : > { %v1073_v36 = vadd.f32 %v1072_v29, %v1071_v32 }
 0x188   : > { %v1174_v1 = vadd.f32 %v1173_v60, %v1172_v62 }
 0x189   : > { %v1074_v40 = vrot.slane %v1073_v36, 4 }
 0x18a   : > { %v1176_v3 = vadd.f32 %v1175_v63, %v1174_v1 }
 0x18b   : > { %v1075_v44 = vadd.f32 %v1074_v40, %v1073_v36 }
 0x18c   : > { %v1178_v4 = vadd.f32 %v1177_v2, %v1176_v3 }
 0x18d   : > { %v1076_v48 = vrot.slane %v1075_v44, 2 }
 0x18e   : > { %v1179_v5 = vrot.slane %v1178_v4, 4 }
 0x18f   : > { %v1077_v52 = vadd.f32 %v1076_v48, %v1075_v44 }
 0x190   : > { %v1180_v6 = vadd.f32 %v1179_v5, %v1178_v4 }
 0x191   : > { %v1078_v56 = vrot.slane %v1077_v52, 1 }
 0x192   : > { %v1181_v7 = vrot.slane %v1180_v6, 2 }
 0x193   : > { %v1079_v61 = vadd.f32 %v1078_v56, %v1077_v52 }
 0x194   : > { %v1182_v8 = vadd.f32 %v1181_v7, %v1180_v6 }
 0x195   : > { %v1080_v0 = vadd.f32 %v1079_v61, %v1010_v58 }
 0x196   : > { %v1183_v9 = vrot.slane %v1182_v8, 1 }
 0x197   : > { %1082 = vst.msk [vmem:[#allocation3] sm:$0x1] %vm1081_vm4, %v1080_v0 }
 0x198   : > { %v1184_v11 = vadd.f32 %v1183_v9, %v1182_v8 }
 0x19a   : > { %v1185_v12 = vadd.f32 %v1184_v11, %v1083_v10 }
 0x19c   : > { %1186 = vst.msk [vmem:[#allocation5] sm:$0x1] %vm1081_vm4, %v1185_v12 }
 0x19d PF: > { %p1966_p7 = scmp.eq.s32.totalorder %s1340_s18, 1  ;;  %s1567_s10 = smov [#allocation3]  }
 0x19e   : > { %s1208_s11 = sshll.u32 %s1567_s10, 4  ;;  %s1568_s12 = smov [#allocation5]   ;;  %s1209_s11 = int_to_ptr.vmem [resolvable:$true] %s1208_s11 }
 0x19f   : > { %s1221_s13 = sshll.u32 %s1568_s12, 4  ;;  %s1486_s14 = scalar_lea.vmem %s1209_s11, 16  ;;  %s1222_s13 = int_to_ptr.vmem [resolvable:$true] %s1221_s13 }
 0x1a0   : > { %p1487_p8 = scmp.ne.s32.totalorder %s1209_s11, %s1486_s14  ;;  %s1492_s15 = scalar_lea.vmem %s1209_s11, 32 }
 0x1a1   : > { %p1493_p11 = scmp.lt.s32.totalorder %s1209_s11, %s1209_s11  ;;  %p1494_p12 = scmp.lt.s32.totalorder %s1492_s15, %s1486_s14 }
 0x1a2   : > { %p1488_p9 = pnand %p1487_p8, %p1966_p7 }
 0x1a3   : > { %p1495_p13 = por %p1494_p12, %p1493_p11 }
 0x1a4   : > { %p1489_p10 = pneg %p1488_p9 }
 0x1a6   : > { %p1496_p0 = pnand %p1495_p13, %p1489_p10 }
 0x1a8   : > { %1499 = shalt.err (!%p1496_p0)
}
 0x1a9   : > { %1445 = dma.vmem_to_hbm [thread:$0]  (%p1966_p7), %s1209_s11, 16, %s2004_s3, [#allocation4]  }
 0x1aa   : > { %s1510_s21 = scalar_lea.vmem %s1222_s13, 16  ;;  %s1516_s22 = scalar_lea.vmem %s1222_s13, 32 }
 0x1ab   : > { %p1511_p1 = scmp.ne.s32.totalorder %s1222_s13, %s1510_s21  ;;  %p1517_p4 = scmp.lt.s32.totalorder %s1222_s13, %s1222_s13 }
 0x1ac   : > { %p1518_p5 = scmp.lt.s32.totalorder %s1516_s22, %s1510_s21 }
 0x1ad   : > { %p1512_p2 = pnand %p1511_p1, %p1966_p7 }
 0x1ae   : > { %p1519_p6 = por %p1518_p5, %p1517_p4 }
 0x1af   : > { %p1513_p3 = pneg %p1512_p2 }
 0x1b1   : > { %p1520_p8 = pnand %p1519_p6, %p1513_p3 }
 0x1b3   : > { %1523 = shalt.err (!%p1520_p8)
}
 0x1b4   : > { %1447 = dma.vmem_to_hbm [thread:$0]  (%p1966_p7), %s1222_s13, 16, %s2005_s4, [#allocation6]  }
 0x1b5   : > { %1547 = dma.done.wait (%p1966_p7), [#allocation4], 16  }
 0x1b6   : > { %1549 = vsyncadd (%p1966_p7), [#allocation4], 4294967280 }
 0x1b7   : > { %1551 = dma.done.wait (%p1966_p7), [#allocation6], 16  }
 0x1b8   : > { %1553 = vsyncadd (%p1966_p7), [#allocation6], 4294967280 }
 0x1b9 PF: > { %s17_s17 = sadd.s32 1, %s1564_s17   ;;  %s2008_s15 = smov %s1560_s16 }
 0x1ba   : > { %p14_p9 = scmp.ge.s32.totalorder %s17_s17, 4   ;;  %s2009_s16 = smov %s2011_s19 }
 0x1bc   :  { %16 = sbr.rel (!%p14_p9) target bundleno = 3 (0x3), region = 96 }
 0x1c1   :  { %1249 = vsyncpa [#allocation4], 1 }
 0x1c2   :  { %1251 = vsyncpa [#allocation4 + $0x1], 1 }
 0x1c3   :  { %1252 = vsyncpa [#allocation6], 1 }

</bundles_post_ra>
